<compile_context>
chip_gen: v5e
topology: v5e:2x2
jax: 0.10.0
libtpu: 0.0.40
codegen_flags: <defaults>
</compile_context>

<pallas_src>
import functools

import jax
import jax.numpy as jnp
from jax.experimental import pallas as pl
from jax.experimental.pallas import tpu as pltpu

# packed-stats lane order of the (1, 8) statistics output
_I_LOSS, _I_PLOSS, _I_WPLOSS, _I_RANK, _I_ACC, _I_STDQ, _I_STDP, _I_STDWQ = range(8)
_NUM_STATS = 8
_MARGIN = 2.0


# ----------------------------------------------------------------------------
# Kernel 1: synthetic encoder (masked mean pooling + projection + normalize)
# grid over the stacked [q; wq; p] row axis in blocks of R rows ("parallel").
# ----------------------------------------------------------------------------
def _encoder_kernel(emb_ref, mask_ref, invc_ref, w_ref, enc_ref, *,
                    R, S, B, norm_query, norm_doc):
    # emb_ref : (R*S, H) bf16 token embeddings for this row block
    # mask_ref: (R*S, 1) bf16 attention mask (exact 0/1 values)
    # invc_ref: (R, 1)   f32  1 / (per-row valid-token count)
    # w_ref   : (H, P)   bf16 projection weight
    emb = emb_ref[...] * mask_ref[...]                               # (R*S, H)

    # Tiny per-block block-diagonal pooling matrix built from iota
    # (pool[r, j] = 1 iff flat token j belongs to row r of this block).
    row = jax.lax.broadcasted_iota(jnp.int32, (R, R * S), 0)
    col = jax.lax.broadcasted_iota(jnp.int32, (R, R * S), 1)
    lo = row * S
    pool = jnp.logical_and(col >= lo, col < lo + S).astype(jnp.bfloat16)

    pooled = jnp.dot(pool, emb, preferred_element_type=jnp.float32)  # (R, H)
    mean = pooled * invc_ref[...]                                    # masked mean
    enc = jnp.dot(mean.astype(jnp.bfloat16), w_ref[...],
                  preferred_element_type=jnp.float32)                # (R, P)

    if norm_query or norm_doc:
        # rsqrt goes to the (otherwise idle) EUP slot; == F.normalize up to eps.
        inv_nrm = jax.lax.rsqrt(
            jnp.maximum(jnp.sum(enc * enc, axis=-1, keepdims=True), 1e-24))
        if norm_query and norm_doc:
            enc = enc * inv_nrm
        else:
            grow = (pl.program_id(0) * R
                    + jax.lax.broadcasted_iota(jnp.int32, (R, 1), 0))
            is_q = grow < 2 * B                    # rows [q ; wq] vs [p]
            sel = is_q if norm_query else jnp.logical_not(is_q)
            enc = jnp.where(sel, enc * inv_nrm, enc)

    enc_ref[...] = enc


def _encoder_pallas(emb_flat, mask_col, inv_counts, w_bf16, *,
                    B, S, norm_query, norm_doc):
    n_rows = 3 * B
    H = emb_flat.shape[1]
    P = w_bf16.shape[1]
    R = 8                                      # rows per grid step (sublane aligned)
    assert n_rows % R == 0
    kernel = functools.partial(_encoder_kernel, R=R, S=S, B=B,
                               norm_query=bool(norm_query),
                               norm_doc=bool(norm_doc))
    return pl.pallas_call(
        kernel,
        out_shape=jax.ShapeDtypeStruct((n_rows, P), jnp.float32),
        grid=(n_rows // R,),
        in_specs=[pl.BlockSpec((R * S, H), lambda i: (i, 0)),
                  pl.BlockSpec((R * S, 1), lambda i: (i, 0)),
                  pl.BlockSpec((R, 1), lambda i: (i, 0)),
                  pl.BlockSpec((H, P), lambda i: (0, 0))],
        out_specs=pl.BlockSpec((R, P), lambda i: (i, 0)),
        compiler_params=pltpu.CompilerParams(
            dimension_semantics=("parallel",)),     # shards rows across v7x's 2 TCs
    )(emb_flat, mask_col, inv_counts, w_bf16)


# ----------------------------------------------------------------------------
# Kernel 2: MoCo logits, losses and statistics, streaming the queue in K tiles
# with online logsumexp / hinge accumulation ("arbitrary" reduction axis).
# ----------------------------------------------------------------------------
def _moco_kernel(enc_ref, qtile_ref, logits_ref, stats_ref,
                 m_ref, l_ref, s_ref, h_ref, pos_ref, *,
                 B, K, TK, temperature, label_smoothing, margin):
    k = pl.program_id(0)
    nk = pl.num_programs(0)
    inv_t = 1.0 / temperature

    enc = enc_ref[...]                      # (3B, P) f32, rows = [q ; wq ; p]
    qwq = enc[:2 * B]                       # (2B, P)
    p = enc[2 * B:]                         # (B, P)

    @pl.when(k == 0)
    def _():
        m_ref[...] = jnp.full(m_ref.shape, -jnp.inf, jnp.float32)
        l_ref[...] = jnp.zeros(l_ref.shape, jnp.float32)
        s_ref[...] = jnp.zeros(s_ref.shape, jnp.float32)
        h_ref[...] = jnp.zeros(h_ref.shape, jnp.float32)
        pos_ref[:B, :] = jnp.sum(enc[:B] * p, axis=-1, keepdims=True) * inv_t
        pos_ref[B:, :] = jnp.sum(enc[B:2 * B] * p, axis=-1, keepdims=True) * inv_t

    pos = pos_ref[...]                      # (2B, 1) scaled positive logits

    # One MXU pass for this queue tile: [q ; wq] @ queue_tile.
    neg = jnp.dot(qwq.astype(jnp.bfloat16), qtile_ref[...],
                  preferred_element_type=jnp.float32) * inv_t       # (2B, TK)

    col = k * TK + jax.lax.broadcasted_iota(jnp.int32, (1, TK), 1)  # global column
    lg = neg + jnp.where(col == 0, pos, 0.0)   # positive lives at column 0
    valid = col <= K                           # only K+1 real logit columns
    valid_f = valid.astype(jnp.float32)

    # ---- online logsumexp / max / sum-of-logits accumulation -----------------
    lg_m = jnp.where(valid, lg, -jnp.inf)
    m_old = m_ref[...]
    m_new = jnp.maximum(m_old, jnp.max(lg_m, axis=-1, keepdims=True))
    alpha = jnp.exp(m_old - m_new)
    l_ref[...] = alpha * l_ref[...] + jnp.sum(jnp.exp(lg_m - m_new),
                                              axis=-1, keepdims=True)
    s_ref[...] = s_ref[...] + jnp.sum(lg * valid_f, axis=-1, keepdims=True)
    m_ref[...] = m_new

    # ---- margin-ranking hinge accumulation (valid columns only) --------------
    hinge = jnp.maximum(margin - (lg[:B] - lg[B:]), 0.0) * valid_f
    h_ref[...] = h_ref[...] + jnp.sum(hinge, axis=-1, keepdims=True)

    # lane-dense p_logits tile store; padded columns are sliced off by the wrapper
    logits_ref[...] = lg[:B]

    @pl.when(k == nk - 1)
    def _():
        # ---- label-smoothed cross entropy with target index 0 ----------------
        N = float(K + 1)
        lse = m_ref[...] + jnp.log(l_ref[...])                      # (2B, 1)
        loss_rows = (lse - (1.0 - label_smoothing) * pos
                     - (label_smoothing / N) * s_ref[...])
        p_loss = jnp.sum(loss_rows[:B], axis=0, keepdims=True) / B  # (1, 1)
        wp_loss = jnp.sum(loss_rows[B:], axis=0, keepdims=True) / B

        correct = (pos >= m_ref[...]).astype(jnp.float32)           # argmax == 0
        correct_p, correct_wp = correct[:B], correct[B:]
        acc = 100.0 * jnp.sum(correct_p, axis=0, keepdims=True) / B

        # ---- margin ranking loss on the "both correct" row intersection ------
        inter = correct_p * correct_wp
        n_inter = jnp.sum(inter, axis=0, keepdims=True)
        h = h_ref[...]
        rank_all = jnp.sum(h, axis=0, keepdims=True) / (B * N)
        rank_sel = (jnp.sum(h * inter, axis=0, keepdims=True)
                    / (jnp.maximum(n_inter, 1.0) * N))
        rank_loss = jnp.where(n_inter > 0.0, rank_sel, rank_all)
        loss = p_loss + rank_loss

        def std_mean(x):   # torch.std(x, dim=0).mean()  (unbiased)
            mu = jnp.sum(x, axis=0, keepdims=True) / B
            var = jnp.sum((x - mu) ** 2, axis=0, keepdims=True) / max(B - 1, 1)
            return jnp.mean(jnp.sqrt(var), axis=-1, keepdims=True)  # (1, 1)

        # pack the 8 scalars into one tiny (1, 8) tile -> single store
        vals = (loss, p_loss, wp_loss, rank_loss, acc,
                std_mean(enc[:B]), std_mean(p), std_mean(enc[B:2 * B]))
        lane = jax.lax.broadcasted_iota(jnp.int32, (1, _NUM_STATS), 1)
        stats = jnp.zeros((1, _NUM_STATS), jnp.float32)
        for i, v in enumerate(vals):
            stats = jnp.where(lane == i, v, stats)
        stats_ref[...] = stats


def _moco_pallas(enc, queue_pad_bf16, *, B, K, temperature, label_smoothing):
    n_rows, P = enc.shape
    assert n_rows == 3 * B and B % 8 == 0
    Kpad = queue_pad_bf16.shape[1]
    # largest power-of-two lane-dense queue tile (<= 512) dividing the padded width
    TK = 512
    while TK > 128 and Kpad % TK:
        TK //= 2
    assert Kpad % TK == 0
    nk = Kpad // TK
    kernel = functools.partial(
        _moco_kernel, B=B, K=K, TK=TK, temperature=float(temperature),
        label_smoothing=float(label_smoothing), margin=_MARGIN)
    # TODO(synk): on v7x, consider an fp8 queue operand and a second "parallel"
    # grid axis over the q/wq row halves to use both TensorCores here too.
    return pl.pallas_call(
        kernel,
        out_shape=(jax.ShapeDtypeStruct((B, Kpad), jnp.float32),
                   jax.ShapeDtypeStruct((1, _NUM_STATS), jnp.float32)),
        grid=(nk,),
        in_specs=[pl.BlockSpec((n_rows, P), lambda k: (0, 0)),   # resident block
                  pl.BlockSpec((P, TK), lambda k: (0, k))],      # streamed queue
        out_specs=(pl.BlockSpec((B, TK), lambda k: (0, k)),
                   pl.BlockSpec((1, _NUM_STATS), lambda k: (0, 0))),
        scratch_shapes=[pltpu.VMEM((2 * B, 1), jnp.float32),     # running max
                        pltpu.VMEM((2 * B, 1), jnp.float32),     # running sum-exp
                        pltpu.VMEM((2 * B, 1), jnp.float32),     # sum of logits
                        pltpu.VMEM((B, 1), jnp.float32),         # hinge row sums
                        pltpu.VMEM((2 * B, 1), jnp.float32)],    # positive logits
        compiler_params=pltpu.CompilerParams(
            dimension_semantics=("arbitrary",),   # K is a reduction axis
            # above the 16/32 MiB default scoped limits, below v7x's 64 MiB VMEM
            vmem_limit_bytes=48 * 1024 * 1024),
    )(enc, queue_pad_bf16)


# ----------------------------------------------------------------------------
# Jitted glue: fused gather + the two Pallas kernels
# ----------------------------------------------------------------------------
@functools.partial(
    jax.jit,
    static_argnames=("queue_size", "temperature", "label_smoothing",
                     "norm_query", "norm_doc"))
def _forward_jit(emb_table, w_proj_bf16, queue_pad_bf16,
                 q_tokens, q_mask, wp_tokens, wp_mask, p_tokens, p_mask,
                 *, queue_size, temperature, label_smoothing,
                 norm_query, norm_doc):
    B, S = q_tokens.shape
    H = emb_table.shape[1]
    # one fused embedding gather for q / wq / p (stays in XLA)
    tokens = jnp.concatenate([q_tokens, wp_tokens, p_tokens], axis=0)   # (3B, S)
    masks = jnp.concatenate([q_mask, wp_mask, p_mask],
                            axis=0).astype(jnp.float32)                 # (3B, S)
    emb_flat = jnp.take(emb_table, tokens, axis=0).reshape(
        3 * B * S, H).astype(jnp.bfloat16)                              # (3B*S, H)
    mask_col = masks.reshape(3 * B * S, 1).astype(jnp.bfloat16)         # exact 0/1
    inv_counts = 1.0 / jnp.maximum(
        jnp.sum(masks, axis=-1, keepdims=True), 1e-9)                   # (3B, 1)

    enc = _encoder_pallas(emb_flat, mask_col, inv_counts, w_proj_bf16,
                          B=B, S=S, norm_query=norm_query, norm_doc=norm_doc)
    logits_pad, stats = _moco_pallas(
        enc, queue_pad_bf16, B=B, K=queue_size,
        temperature=temperature, label_smoothing=label_smoothing)
    logits = logits_pad[:, :queue_size + 1]    # drop the lane padding
    loss = stats[0, 0]
    return loss, logits, stats


# ----------------------------------------------------------------------------
# TimeMoCoQ2 forward wrapper
# ----------------------------------------------------------------------------
class TimeMoCoQ2Pallas:
    def __init__(self, *, projection_size, queue_size, temperature,
                 label_smoothing, norm_query, norm_doc,
                 vocab_size, hidden_size, key):
        self.queue_size = int(queue_size)
        self.temperature = float(temperature)
        self.label_smoothing = float(label_smoothing)
        self.norm_query = bool(norm_query)
        self.norm_doc = bool(norm_doc)
        k1, k2, k3 = jax.random.split(key, 3)
        # deterministic synthetic "retriever" parameters (shared q / k encoders)
        self.emb_table = 0.02 * jax.random.normal(
            k1, (vocab_size, hidden_size), jnp.float32)
        self.w_proj = 0.05 * jax.random.normal(
            k2, (hidden_size, projection_size), jnp.float32)
        self.w_proj_bf16 = self.w_proj.astype(jnp.bfloat16)
        # p_queue buffer: randn(projection_size, queue_size), column-normalized
        pq = jax.random.normal(k3, (projection_size, queue_size), jnp.float32)
        self.p_queue = pq / jnp.maximum(
            jnp.sqrt(jnp.sum(pq * pq, axis=0, keepdims=True)), 1e-12)
        # Lane-dense padded queue: column 0 reserved for the positive logit and
        # trailing zero columns so the logits width is a multiple of 128; padded
        # columns are masked out of the losses inside the kernel.
        k_plus_1 = self.queue_size + 1
        k_padded = ((k_plus_1 + 127) // 128) * 128
        pad_cols = k_padded - k_plus_1
        self.p_queue_pad_bf16 = jnp.concatenate(
            [jnp.zeros((projection_size, 1), jnp.float32),
             self.p_queue,
             jnp.zeros((projection_size, pad_cols), jnp.float32)],
            axis=1).astype(jnp.bfloat16)
        # TODO(synk): wp_queue, momentum update of encoder_k and the queue
        # dequeue/enqueue are training-time buffer mutations (stats_prefix ==
        # 'train'); not part of this stateless forward.

    def __call__(self, q_tokens, q_mask, k_tokens, k_mask, *,
                 p_tokens, p_mask, wp_tokens, wp_mask,
                 stats_prefix='', iter_stats=None):
        if iter_stats is None:
            iter_stats = {}
        bsz = int(q_tokens.shape[0])

        loss, logits, stats = _forward_jit(
            self.emb_table, self.w_proj_bf16, self.p_queue_pad_bf16,
            q_tokens, q_mask, wp_tokens, wp_mask, p_tokens, p_mask,
            queue_size=self.queue_size, temperature=self.temperature,
            label_smoothing=self.label_smoothing,
            norm_query=self.norm_query, norm_doc=self.norm_doc)

        # single blocking device->host transfer for all 8 statistics
        s = jax.device_get(stats)[0]
        if len(stats_prefix) > 0:
            stats_prefix = stats_prefix + '/'
        iter_stats[f'{stats_prefix}p_loss'] = (float(s[_I_PLOSS]), bsz)
        iter_stats[f'{stats_prefix}wp_loss'] = (float(s[_I_WPLOSS]), bsz)
        iter_stats[f'{stats_prefix}rank_loss'] = (float(s[_I_RANK]), bsz)
        iter_stats[f'{stats_prefix}all_loss'] = (float(s[_I_LOSS]), bsz)
        iter_stats[f'{stats_prefix}accuracy'] = (float(s[_I_ACC]), bsz)
        iter_stats[f'{stats_prefix}stdq'] = (float(s[_I_STDQ]), bsz)
        iter_stats[f'{stats_prefix}stdp'] = (float(s[_I_STDP]), bsz)
        iter_stats[f'{stats_prefix}stdwq'] = (float(s[_I_STDWQ]), bsz)
        return loss, iter_stats, logits


# ----------------------------------------------------------------------------
# main
# ----------------------------------------------------------------------------
if __name__ == "__main__":
    key = jax.random.PRNGKey(0)
    kparam, ktok = jax.random.split(key)

    B, S = 8, 8                  # batch (multiple of 8), sequence length
    VOCAB, H, P = 64, 128, 128   # vocab, hidden, projection (MXU-aligned)
    QUEUE = 256                  # queue_size -> K+1 = 257, padded to 384 lanes

    model = TimeMoCoQ2Pallas(
        projection_size=P, queue_size=QUEUE,
        temperature=0.05, label_smoothing=0.1,
        norm_query=True, norm_doc=True,
        vocab_size=VOCAB, hidden_size=H, key=kparam)

    k1, k2, k3, k4, k5 = jax.random.split(ktok, 5)
    q_tokens = jax.random.randint(k1, (B, S), 0, VOCAB)
    p_tokens = jax.random.randint(k2, (B, S), 0, VOCAB)
    wp_tokens = jax.random.randint(k3, (B, S), 0, VOCAB)
    k_tokens = jax.random.randint(k4, (B, S), 0, VOCAB)  # unused by forward (as in PyTorch)
    mask = (jax.random.uniform(k5, (B, S)) > 0.2).astype(jnp.float32)
    mask = mask.at[:, 0].set(1.0)
    q_mask = p_mask = wp_mask = k_mask = mask

    loss, stats, logits = model(q_tokens, q_mask, k_tokens, k_mask,
                                p_tokens=p_tokens, p_mask=p_mask,
                                wp_tokens=wp_tokens, wp_mask=wp_mask)
    jax.block_until_ready(loss)
    jax.block_until_ready(logits)
    print("KERNEL_OK")
</pallas_src>

<mosaic_0001>
module attributes {stable_mosaic.version = 11 : i64} {
  func.func @_encoder_kernel(%arg0: i32, %arg1: memref<64x128xbf16, #tpu.memory_space<vmem>>, %arg2: memref<64x1xbf16, #tpu.memory_space<vmem>>, %arg3: memref<8x1xf32, #tpu.memory_space<vmem>>, %arg4: memref<128x128xbf16, #tpu.memory_space<vmem>>, %arg5: memref<8x128xf32, #tpu.memory_space<vmem>>) attributes {dimension_semantics = [#tpu.dimension_semantics<parallel>], iteration_bounds = array<i64: 3>, scalar_prefetch = 0 : i64, scratch_operands = 0 : i64, tpu.core_type = #tpu.core_type<tc>, window_params = [{transform_indices = @transform_0, window_bounds = array<i64: 64, 128>}, {transform_indices = @transform_1, window_bounds = array<i64: 64, 1>}, {transform_indices = @transform_2, window_bounds = array<i64: 8, 1>}, {pipeline_mode = #tpu.pipeline_mode<synchronous>, transform_indices = @transform_3, window_bounds = array<i64: 128, 128>}, {transform_indices = @transform_4, window_bounds = array<i64: 8, 128>}]} {
    %c0 = arith.constant 0 : index
    %c0_0 = arith.constant 0 : index
    %0 = vector.load %arg1[%c0, %c0_0] : memref<64x128xbf16, #tpu.memory_space<vmem>>, vector<64x128xbf16>
    %c0_1 = arith.constant 0 : index
    %c0_2 = arith.constant 0 : index
    %1 = vector.load %arg2[%c0_1, %c0_2] : memref<64x1xbf16, #tpu.memory_space<vmem>>, vector<64x1xbf16>
    %2 = vector.broadcast %1 : vector<64x1xbf16> to vector<64x128xbf16>
    %3 = arith.mulf %0, %2 : vector<64x128xbf16>
    %4 = tpu.iota {dimensions = array<i32: 0>} : vector<8x64xi32>
    %5 = tpu.iota {dimensions = array<i32: 1>} : vector<8x64xi32>
    %c8_i32 = arith.constant 8 : i32
    %6 = vector.broadcast %c8_i32 : i32 to vector<8x64xi32>
    %7 = arith.muli %4, %6 : vector<8x64xi32>
    %8 = arith.cmpi sge, %5, %7 : vector<8x64xi32>
    %c8_i32_3 = arith.constant 8 : i32
    %9 = vector.broadcast %c8_i32_3 : i32 to vector<8x64xi32>
    %10 = arith.addi %7, %9 : vector<8x64xi32>
    %11 = arith.cmpi slt, %5, %10 : vector<8x64xi32>
    %12 = arith.andi %8, %11 : vector<8x64xi1>
    %13 = arith.extui %12 : vector<8x64xi1> to vector<8x64xi32>
    %14 = arith.sitofp %13 : vector<8x64xi32> to vector<8x64xf32>
    %15 = arith.truncf %14 : vector<8x64xf32> to vector<8x64xbf16>
    %cst = arith.constant dense<0.000000e+00> : vector<8x128xf32>
    %16 = tpu.matmul %15, %3, %cst {dimension_numbers = #tpu.dot_dimension_numbers<[1], [0], [0], [1], [0, 0, 1, 1], [], []>} : vector<8x64xbf16>, vector<64x128xbf16>, vector<8x128xf32> -> vector<8x128xf32>
    %c0_4 = arith.constant 0 : index
    %c0_5 = arith.constant 0 : index
    %17 = vector.load %arg3[%c0_4, %c0_5] : memref<8x1xf32, #tpu.memory_space<vmem>>, vector<8x1xf32>
    %18 = vector.broadcast %17 : vector<8x1xf32> to vector<8x128xf32>
    %19 = arith.mulf %16, %18 : vector<8x128xf32>
    %20 = arith.truncf %19 : vector<8x128xf32> to vector<8x128xbf16>
    %c0_6 = arith.constant 0 : index
    %c0_7 = arith.constant 0 : index
    %21 = vector.load %arg4[%c0_6, %c0_7] : memref<128x128xbf16, #tpu.memory_space<vmem>>, vector<128x128xbf16>
    %cst_8 = arith.constant dense<0.000000e+00> : vector<8x128xf32>
    %22 = tpu.matmul %20, %21, %cst_8 {dimension_numbers = #tpu.dot_dimension_numbers<[1], [0], [0], [1], [0, 0, 1, 1], [], []>} : vector<8x128xbf16>, vector<128x128xbf16>, vector<8x128xf32> -> vector<8x128xf32>
    %23 = arith.mulf %22, %22 : vector<8x128xf32>
    %cst_9 = arith.constant dense<0.000000e+00> : vector<8xf32>
    %24 = vector.multi_reduction <add>, %23, %cst_9 [1] : vector<8x128xf32> to vector<8xf32>
    %25 = vector.shape_cast %24 : vector<8xf32> to vector<8x1xf32>
    %cst_10 = arith.constant 1.000000e-24 : f32
    %26 = vector.broadcast %cst_10 : f32 to vector<8x1xf32>
    %27 = arith.maximumf %25, %26 : vector<8x1xf32>
    %28 = math.rsqrt %27 : vector<8x1xf32>
    %29 = vector.broadcast %28 : vector<8x1xf32> to vector<8x128xf32>
    %30 = arith.mulf %22, %29 : vector<8x128xf32>
    %c0_11 = arith.constant 0 : index
    %c0_12 = arith.constant 0 : index
    %31 = vector.load %arg5[%c0_11, %c0_12] : memref<8x128xf32, #tpu.memory_space<vmem>>, vector<8x128xf32>
    tpu.vector_store %arg5[%c0_11, %c0_12], %30 {strides = array<i32>} : memref<8x128xf32, #tpu.memory_space<vmem>>, vector<8x128xf32>,
    return
  }
  func.func @transform_0(%arg0: i32) -> (i32, i32) {
    %c0_i32 = arith.constant 0 : i32
    %c0_i32_0 = arith.constant 0 : i32
    return %arg0, %c0_i32 : i32, i32
  }
  func.func @transform_1(%arg0: i32) -> (i32, i32) {
    %c0_i32 = arith.constant 0 : i32
    %c0_i32_0 = arith.constant 0 : i32
    return %arg0, %c0_i32 : i32, i32
  }
  func.func @transform_2(%arg0: i32) -> (i32, i32) {
    %c0_i32 = arith.constant 0 : i32
    %c0_i32_0 = arith.constant 0 : i32
    return %arg0, %c0_i32 : i32, i32
  }
  func.func @transform_3(%arg0: i32) -> (i32, i32) {
    %c0_i32 = arith.constant 0 : i32
    %c0_i32_0 = arith.constant 0 : i32
    %c0_i32_1 = arith.constant 0 : i32
    return %c0_i32, %c0_i32_0 : i32, i32
  }
  func.func @transform_4(%arg0: i32) -> (i32, i32) {
    %c0_i32 = arith.constant 0 : i32
    %c0_i32_0 = arith.constant 0 : i32
    return %arg0, %c0_i32 : i32, i32
  }
}

module attributes {stable_mosaic.version = 11 : i64} {
  func.func @_moco_kernel(%arg0: i32, %arg1: memref<24x128xf32, #tpu.memory_space<vmem>>, %arg2: memref<128x128xbf16, #tpu.memory_space<vmem>>, %arg3: memref<8x128xf32, #tpu.memory_space<vmem>>, %arg4: memref<1x8xf32, #tpu.memory_space<vmem>>, %arg5: memref<16x1xf32, #tpu.memory_space<vmem>>, %arg6: memref<16x1xf32, #tpu.memory_space<vmem>>, %arg7: memref<16x1xf32, #tpu.memory_space<vmem>>, %arg8: memref<8x1xf32, #tpu.memory_space<vmem>>, %arg9: memref<16x1xf32, #tpu.memory_space<vmem>>) attributes {dimension_semantics = [#tpu.dimension_semantics<arbitrary>], iteration_bounds = array<i64: 3>, scalar_prefetch = 0 : i64, scratch_operands = 5 : i64, tpu.core_type = #tpu.core_type<tc>, window_params = [{pipeline_mode = #tpu.pipeline_mode<synchronous>, transform_indices = @transform_0, window_bounds = array<i64: 24, 128>}, {transform_indices = @transform_1, window_bounds = array<i64: 128, 128>}, {transform_indices = @transform_2, window_bounds = array<i64: 8, 128>}, {pipeline_mode = #tpu.pipeline_mode<synchronous>, transform_indices = @transform_3, window_bounds = array<i64: 1, 8>}]} {
    %c0 = arith.constant 0 : index
    %c0_0 = arith.constant 0 : index
    %0 = vector.load %arg1[%c0, %c0_0] : memref<24x128xf32, #tpu.memory_space<vmem>>, vector<24x128xf32>
    %1 = vector.extract_strided_slice %0 {offsets = [0, 0], sizes = [16, 128], strides = [1, 1]} : vector<24x128xf32> to vector<16x128xf32>
    %2 = vector.extract_strided_slice %0 {offsets = [16, 0], sizes = [8, 128], strides = [1, 1]} : vector<24x128xf32> to vector<8x128xf32>
    %c0_i32 = arith.constant 0 : i32
    %3 = arith.cmpi eq, %arg0, %c0_i32 : i32
    %4 = arith.extui %3 : i1 to i32
    %c0_i32_1 = arith.constant 0 : i32
    %5 = arith.cmpi ne, %4, %c0_i32_1 : i32
    scf.if %5 {
      %cst_35 = arith.constant 0xFF800000 : f32
      %75 = vector.broadcast %cst_35 : f32 to vector<16x1xf32>
      %c0_36 = arith.constant 0 : index
      %c0_37 = arith.constant 0 : index
      %76 = vector.load %arg5[%c0_36, %c0_37] : memref<16x1xf32, #tpu.memory_space<vmem>>, vector<16x1xf32>
      tpu.vector_store %arg5[%c0_36, %c0_37], %75 {strides = array<i32>} : memref<16x1xf32, #tpu.memory_space<vmem>>, vector<16x1xf32>,
      %cst_38 = arith.constant 0.000000e+00 : f32
      %77 = vector.broadcast %cst_38 : f32 to vector<16x1xf32>
      %c0_39 = arith.constant 0 : index
      %c0_40 = arith.constant 0 : index
      %78 = vector.load %arg6[%c0_39, %c0_40] : memref<16x1xf32, #tpu.memory_space<vmem>>, vector<16x1xf32>
      tpu.vector_store %arg6[%c0_39, %c0_40], %77 {strides = array<i32>} : memref<16x1xf32, #tpu.memory_space<vmem>>, vector<16x1xf32>,
      %cst_41 = arith.constant 0.000000e+00 : f32
      %79 = vector.broadcast %cst_41 : f32 to vector<16x1xf32>
      %c0_42 = arith.constant 0 : index
      %c0_43 = arith.constant 0 : index
      %80 = vector.load %arg7[%c0_42, %c0_43] : memref<16x1xf32, #tpu.memory_space<vmem>>, vector<16x1xf32>
      tpu.vector_store %arg7[%c0_42, %c0_43], %79 {strides = array<i32>} : memref<16x1xf32, #tpu.memory_space<vmem>>, vector<16x1xf32>,
      %cst_44 = arith.constant 0.000000e+00 : f32
      %81 = vector.broadcast %cst_44 : f32 to vector<8x1xf32>
      %c0_45 = arith.constant 0 : index
      %c0_46 = arith.constant 0 : index
      %82 = vector.load %arg8[%c0_45, %c0_46] : memref<8x1xf32, #tpu.memory_space<vmem>>, vector<8x1xf32>
      tpu.vector_store %arg8[%c0_45, %c0_46], %81 {strides = array<i32>} : memref<8x1xf32, #tpu.memory_space<vmem>>, vector<8x1xf32>,
      %83 = vector.extract_strided_slice %0 {offsets = [0, 0], sizes = [8, 128], strides = [1, 1]} : vector<24x128xf32> to vector<8x128xf32>
      %84 = arith.mulf %83, %2 : vector<8x128xf32>
      %cst_47 = arith.constant dense<0.000000e+00> : vector<8xf32>
      %85 = vector.multi_reduction <add>, %84, %cst_47 [1] : vector<8x128xf32> to vector<8xf32>
      %86 = vector.shape_cast %85 : vector<8xf32> to vector<8x1xf32>
      %cst_48 = arith.constant 2.000000e+01 : f32
      %87 = vector.broadcast %cst_48 : f32 to vector<8x1xf32>
      %88 = arith.mulf %86, %87 : vector<8x1xf32>
      %c0_49 = arith.constant 0 : index
      %c0_50 = arith.constant 0 : index
      %89 = vector.load %arg9[%c0_49, %c0_50] : memref<16x1xf32, #tpu.memory_space<vmem>>, vector<8x1xf32>
      tpu.vector_store %arg9[%c0_49, %c0_50], %88 {strides = array<i32>} : memref<16x1xf32, #tpu.memory_space<vmem>>, vector<8x1xf32>,
      %90 = vector.extract_strided_slice %0 {offsets = [8, 0], sizes = [8, 128], strides = [1, 1]} : vector<24x128xf32> to vector<8x128xf32>
      %91 = arith.mulf %90, %2 : vector<8x128xf32>
      %cst_51 = arith.constant dense<0.000000e+00> : vector<8xf32>
      %92 = vector.multi_reduction <add>, %91, %cst_51 [1] : vector<8x128xf32> to vector<8xf32>
      %93 = vector.shape_cast %92 : vector<8xf32> to vector<8x1xf32>
      %cst_52 = arith.constant 2.000000e+01 : f32
      %94 = vector.broadcast %cst_52 : f32 to vector<8x1xf32>
      %95 = arith.mulf %93, %94 : vector<8x1xf32>
      %c8 = arith.constant 8 : index
      %c0_53 = arith.constant 0 : index
      %96 = vector.load %arg9[%c8, %c0_53] : memref<16x1xf32, #tpu.memory_space<vmem>>, vector<8x1xf32>
      tpu.vector_store %arg9[%c8, %c0_53], %95 {strides = array<i32>} : memref<16x1xf32, #tpu.memory_space<vmem>>, vector<8x1xf32>,
    } else {
    }
    %c0_2 = arith.constant 0 : index
    %c0_3 = arith.constant 0 : index
    %6 = vector.load %arg9[%c0_2, %c0_3] : memref<16x1xf32, #tpu.memory_space<vmem>>, vector<16x1xf32>
    %7 = arith.truncf %1 : vector<16x128xf32> to vector<16x128xbf16>
    %c0_4 = arith.constant 0 : index
    %c0_5 = arith.constant 0 : index
    %8 = vector.load %arg2[%c0_4, %c0_5] : memref<128x128xbf16, #tpu.memory_space<vmem>>, vector<128x128xbf16>
    %cst = arith.constant dense<0.000000e+00> : vector<16x128xf32>
    %9 = tpu.matmul %7, %8, %cst {dimension_numbers = #tpu.dot_dimension_numbers<[1], [0], [0], [1], [0, 0, 1, 1], [], []>} : vector<16x128xbf16>, vector<128x128xbf16>, vector<16x128xf32> -> vector<16x128xf32>
    %cst_6 = arith.constant 2.000000e+01 : f32
    %10 = vector.broadcast %cst_6 : f32 to vector<16x128xf32>
    %11 = arith.mulf %9, %10 : vector<16x128xf32>
    %c128_i32 = arith.constant 128 : i32
    %12 = arith.muli %arg0, %c128_i32 : i32
    %13 = tpu.iota {dimensions = array<i32: 1>} : vector<1x128xi32>
    %14 = vector.broadcast %12 : i32 to vector<1x128xi32>
    %15 = arith.addi %14, %13 : vector<1x128xi32>
    %c0_i32_7 = arith.constant 0 : i32
    %16 = vector.broadcast %c0_i32_7 : i32 to vector<1x128xi32>
    %17 = arith.cmpi eq, %15, %16 : vector<1x128xi32>
    %cst_8 = arith.constant 0.000000e+00 : f32
    %18 = vector.shape_cast %17 : vector<1x128xi1> to vector<1x128xi1>
    %19 = vector.broadcast %18 : vector<1x128xi1> to vector<16x128xi1>
    %20 = vector.shape_cast %6 : vector<16x1xf32> to vector<16x1xf32>
    %21 = vector.broadcast %20 : vector<16x1xf32> to vector<16x128xf32>
    %22 = vector.broadcast %cst_8 : f32 to vector<16x128xf32>
    %23 = arith.select %19, %21, %22 : vector<16x128xi1>, vector<16x128xf32>
    %24 = arith.addf %11, %23 : vector<16x128xf32>
    %c256_i32 = arith.constant 256 : i32
    %25 = vector.broadcast %c256_i32 : i32 to vector<1x128xi32>
    %26 = arith.cmpi sle, %15, %25 : vector<1x128xi32>
    %27 = arith.extui %26 : vector<1x128xi1> to vector<1x128xi32>
    %28 = arith.sitofp %27 : vector<1x128xi32> to vector<1x128xf32>
    %cst_9 = arith.constant 0xFF800000 : f32
    %29 = vector.shape_cast %26 : vector<1x128xi1> to vector<1x128xi1>
    %30 = vector.broadcast %29 : vector<1x128xi1> to vector<16x128xi1>
    %31 = vector.broadcast %cst_9 : f32 to vector<16x128xf32>
    %32 = arith.select %30, %24, %31 : vector<16x128xi1>, vector<16x128xf32>
    %c0_10 = arith.constant 0 : index
    %c0_11 = arith.constant 0 : index
    %33 = vector.load %arg5[%c0_10, %c0_11] : memref<16x1xf32, #tpu.memory_space<vmem>>, vector<16x1xf32>
    %cst_12 = arith.constant dense<0xFF800000> : vector<16xf32>
    %34 = vector.multi_reduction <maximumf>, %32, %cst_12 [1] : vector<16x128xf32> to vector<16xf32>
    %35 = vector.shape_cast %34 : vector<16xf32> to vector<16x1xf32>
    %36 = arith.maximumf %33, %35 : vector<16x1xf32>
    %37 = arith.subf %33, %36 : vector<16x1xf32>
    %38 = math.exp %37 : vector<16x1xf32>
    %c0_13 = arith.constant 0 : index
    %c0_14 = arith.constant 0 : index
    %39 = vector.load %arg6[%c0_13, %c0_14] : memref<16x1xf32, #tpu.memory_space<vmem>>, vector<16x1xf32>
    %40 = arith.mulf %38, %39 : vector<16x1xf32>
    %41 = vector.broadcast %36 : vector<16x1xf32> to vector<16x128xf32>
    %42 = arith.subf %32, %41 : vector<16x128xf32>
    %43 = math.exp %42 : vector<16x128xf32>
    %cst_15 = arith.constant dense<0.000000e+00> : vector<16xf32>
    %44 = vector.multi_reduction <add>, %43, %cst_15 [1] : vector<16x128xf32> to vector<16xf32>
    %45 = vector.shape_cast %44 : vector<16xf32> to vector<16x1xf32>
    %46 = arith.addf %40, %45 : vector<16x1xf32>
    %c0_16 = arith.constant 0 : index
    %c0_17 = arith.constant 0 : index
    %47 = vector.load %arg6[%c0_16, %c0_17] : memref<16x1xf32, #tpu.memory_space<vmem>>, vector<16x1xf32>
    tpu.vector_store %arg6[%c0_16, %c0_17], %46 {strides = array<i32>} : memref<16x1xf32, #tpu.memory_space<vmem>>, vector<16x1xf32>,
    %c0_18 = arith.constant 0 : index
    %c0_19 = arith.constant 0 : index
    %48 = vector.load %arg7[%c0_18, %c0_19] : memref<16x1xf32, #tpu.memory_space<vmem>>, vector<16x1xf32>
    %49 = vector.broadcast %28 : vector<1x128xf32> to vector<16x128xf32>
    %50 = arith.mulf %24, %49 : vector<16x128xf32>
    %cst_20 = arith.constant dense<0.000000e+00> : vector<16xf32>
    %51 = vector.multi_reduction <add>, %50, %cst_20 [1] : vector<16x128xf32> to vector<16xf32>
    %52 = vector.shape_cast %51 : vector<16xf32> to vector<16x1xf32>
    %53 = arith.addf %48, %52 : vector<16x1xf32>
    %c0_21 = arith.constant 0 : index
    %c0_22 = arith.constant 0 : index
    %54 = vector.load %arg7[%c0_21, %c0_22] : memref<16x1xf32, #tpu.memory_space<vmem>>, vector<16x1xf32>
    tpu.vector_store %arg7[%c0_21, %c0_22], %53 {strides = array<i32>} : memref<16x1xf32, #tpu.memory_space<vmem>>, vector<16x1xf32>,
    %c0_23 = arith.constant 0 : index
    %c0_24 = arith.constant 0 : index
    %55 = vector.load %arg5[%c0_23, %c0_24] : memref<16x1xf32, #tpu.memory_space<vmem>>, vector<16x1xf32>
    tpu.vector_store %arg5[%c0_23, %c0_24], %36 {strides = array<i32>} : memref<16x1xf32, #tpu.memory_space<vmem>>, vector<16x1xf32>,
    %56 = vector.extract_strided_slice %24 {offsets = [0, 0], sizes = [8, 128], strides = [1, 1]} : vector<16x128xf32> to vector<8x128xf32>
    %57 = vector.extract_strided_slice %24 {offsets = [8, 0], sizes = [8, 128], strides = [1, 1]} : vector<16x128xf32> to vector<8x128xf32>
    %58 = arith.subf %56, %57 : vector<8x128xf32>
    %cst_25 = arith.constant 2.000000e+00 : f32
    %59 = vector.broadcast %cst_25 : f32 to vector<8x128xf32>
    %60 = arith.subf %59, %58 : vector<8x128xf32>
    %cst_26 = arith.constant 0.000000e+00 : f32
    %61 = vector.broadcast %cst_26 : f32 to vector<8x128xf32>
    %62 = arith.maximumf %60, %61 : vector<8x128xf32>
    %63 = vector.broadcast %28 : vector<1x128xf32> to vector<8x128xf32>
    %64 = arith.mulf %62, %63 : vector<8x128xf32>
    %c0_27 = arith.constant 0 : index
    %c0_28 = arith.constant 0 : index
    %65 = vector.load %arg8[%c0_27, %c0_28] : memref<8x1xf32, #tpu.memory_space<vmem>>, vector<8x1xf32>
    %cst_29 = arith.constant dense<0.000000e+00> : vector<8xf32>
    %66 = vector.multi_reduction <add>, %64, %cst_29 [1] : vector<8x128xf32> to vector<8xf32>
    %67 = vector.shape_cast %66 : vector<8xf32> to vector<8x1xf32>
    %68 = arith.addf %65, %67 : vector<8x1xf32>
    %c0_30 = arith.constant 0 : index
    %c0_31 = arith.constant 0 : index
    %69 = vector.load %arg8[%c0_30, %c0_31] : memref<8x1xf32, #tpu.memory_space<vmem>>, vector<8x1xf32>
    tpu.vector_store %arg8[%c0_30, %c0_31], %68 {strides = array<i32>} : memref<8x1xf32, #tpu.memory_space<vmem>>, vector<8x1xf32>,
    %70 = vector.extract_strided_slice %24 {offsets = [0, 0], sizes = [8, 128], strides = [1, 1]} : vector<16x128xf32> to vector<8x128xf32>
    %c0_32 = arith.constant 0 : index
    %c0_33 = arith.constant 0 : index
    %71 = vector.load %arg3[%c0_32, %c0_33] : memref<8x128xf32, #tpu.memory_space<vmem>>, vector<8x128xf32>
    tpu.vector_store %arg3[%c0_32, %c0_33], %70 {strides = array<i32>} : memref<8x128xf32, #tpu.memory_space<vmem>>, vector<8x128xf32>,
    %c2_i32 = arith.constant 2 : i32
    %72 = arith.cmpi eq, %arg0, %c2_i32 : i32
    %73 = arith.extui %72 : i1 to i32
    %c0_i32_34 = arith.constant 0 : i32
    %74 = arith.cmpi ne, %73, %c0_i32_34 : i32
    scf.if %74 {
      %c0_35 = arith.constant 0 : index
      %c0_36 = arith.constant 0 : index
      %75 = vector.load %arg5[%c0_35, %c0_36] : memref<16x1xf32, #tpu.memory_space<vmem>>, vector<16x1xf32>
      %c0_37 = arith.constant 0 : index
      %c0_38 = arith.constant 0 : index
      %76 = vector.load %arg6[%c0_37, %c0_38] : memref<16x1xf32, #tpu.memory_space<vmem>>, vector<16x1xf32>
      %77 = math.log %76 : vector<16x1xf32>
      %78 = arith.addf %75, %77 : vector<16x1xf32>
      %cst_39 = arith.constant 0.899999976 : f32
      %79 = vector.broadcast %cst_39 : f32 to vector<16x1xf32>
      %80 = arith.mulf %79, %6 : vector<16x1xf32>
      %81 = arith.subf %78, %80 : vector<16x1xf32>
      %c0_40 = arith.constant 0 : index
      %c0_41 = arith.constant 0 : index
      %82 = vector.load %arg7[%c0_40, %c0_41] : memref<16x1xf32, #tpu.memory_space<vmem>>, vector<16x1xf32>
      %cst_42 = arith.constant 3.89105058E-4 : f32
      %83 = vector.broadcast %cst_42 : f32 to vector<16x1xf32>
      %84 = arith.mulf %83, %82 : vector<16x1xf32>
      %85 = arith.subf %81, %84 : vector<16x1xf32>
      %86 = vector.extract_strided_slice %85 {offsets = [0, 0], sizes = [8, 1], strides = [1, 1]} : vector<16x1xf32> to vector<8x1xf32>
      %cst_43 = arith.constant dense<0.000000e+00> : vector<1xf32>
      %87 = vector.multi_reduction <add>, %86, %cst_43 [0] : vector<8x1xf32> to vector<1xf32>
      %88 = vector.shape_cast %87 : vector<1xf32> to vector<1x1xf32>
      %cst_44 = arith.constant 8.000000e+00 : f32
      %89 = vector.broadcast %cst_44 : f32 to vector<1x1xf32>
      %90 = arith.divf %88, %89 : vector<1x1xf32>
      %91 = vector.extract_strided_slice %85 {offsets = [8, 0], sizes = [8, 1], strides = [1, 1]} : vector<16x1xf32> to vector<8x1xf32>
      %cst_45 = arith.constant dense<0.000000e+00> : vector<1xf32>
      %92 = vector.multi_reduction <add>, %91, %cst_45 [0] : vector<8x1xf32> to vector<1xf32>
      %93 = vector.shape_cast %92 : vector<1xf32> to vector<1x1xf32>
      %cst_46 = arith.constant 8.000000e+00 : f32
      %94 = vector.broadcast %cst_46 : f32 to vector<1x1xf32>
      %95 = arith.divf %93, %94 : vector<1x1xf32>
      %c0_47 = arith.constant 0 : index
      %c0_48 = arith.constant 0 : index
      %96 = vector.load %arg5[%c0_47, %c0_48] : memref<16x1xf32, #tpu.memory_space<vmem>>, vector<16x1xf32>
      %97 = arith.cmpf oge, %6, %96 : vector<16x1xf32>
      %98 = arith.extui %97 : vector<16x1xi1> to vector<16x1xi32>
      %99 = arith.sitofp %98 : vector<16x1xi32> to vector<16x1xf32>
      %100 = vector.extract_strided_slice %99 {offsets = [0, 0], sizes = [8, 1], strides = [1, 1]} : vector<16x1xf32> to vector<8x1xf32>
      %101 = vector.extract_strided_slice %99 {offsets = [8, 0], sizes = [8, 1], strides = [1, 1]} : vector<16x1xf32> to vector<8x1xf32>
      %cst_49 = arith.constant dense<0.000000e+00> : vector<1xf32>
      %102 = vector.multi_reduction <add>, %100, %cst_49 [0] : vector<8x1xf32> to vector<1xf32>
      %103 = vector.shape_cast %102 : vector<1xf32> to vector<1x1xf32>
      %cst_50 = arith.constant 1.000000e+02 : f32
      %104 = vector.broadcast %cst_50 : f32 to vector<1x1xf32>
      %105 = arith.mulf %104, %103 : vector<1x1xf32>
      %cst_51 = arith.constant 8.000000e+00 : f32
      %106 = vector.broadcast %cst_51 : f32 to vector<1x1xf32>
      %107 = arith.divf %105, %106 : vector<1x1xf32>
      %108 = arith.mulf %100, %101 : vector<8x1xf32>
      %cst_52 = arith.constant dense<0.000000e+00> : vector<1xf32>
      %109 = vector.multi_reduction <add>, %108, %cst_52 [0] : vector<8x1xf32> to vector<1xf32>
      %110 = vector.shape_cast %109 : vector<1xf32> to vector<1x1xf32>
      %c0_53 = arith.constant 0 : index
      %c0_54 = arith.constant 0 : index
      %111 = vector.load %arg8[%c0_53, %c0_54] : memref<8x1xf32, #tpu.memory_space<vmem>>, vector<8x1xf32>
      %cst_55 = arith.constant dense<0.000000e+00> : vector<1xf32>
      %112 = vector.multi_reduction <add>, %111, %cst_55 [0] : vector<8x1xf32> to vector<1xf32>
      %113 = vector.shape_cast %112 : vector<1xf32> to vector<1x1xf32>
      %cst_56 = arith.constant 2.056000e+03 : f32
      %114 = vector.broadcast %cst_56 : f32 to vector<1x1xf32>
      %115 = arith.divf %113, %114 : vector<1x1xf32>
      %116 = arith.mulf %111, %108 : vector<8x1xf32>
      %cst_57 = arith.constant dense<0.000000e+00> : vector<1xf32>
      %117 = vector.multi_reduction <add>, %116, %cst_57 [0] : vector<8x1xf32> to vector<1xf32>
      %118 = vector.shape_cast %117 : vector<1xf32> to vector<1x1xf32>
      %cst_58 = arith.constant 1.000000e+00 : f32
      %119 = vector.broadcast %cst_58 : f32 to vector<1x1xf32>
      %120 = arith.maximumf %110, %119 : vector<1x1xf32>
      %cst_59 = arith.constant 2.570000e+02 : f32
      %121 = vector.broadcast %cst_59 : f32 to vector<1x1xf32>
      %122 = arith.mulf %120, %121 : vector<1x1xf32>
      %123 = arith.divf %118, %122 : vector<1x1xf32>
      %cst_60 = arith.constant 0.000000e+00 : f32
      %124 = vector.broadcast %cst_60 : f32 to vector<1x1xf32>
      %125 = arith.cmpf ogt, %110, %124 : vector<1x1xf32>
      %126 = arith.select %125, %123, %115 : vector<1x1xi1>, vector<1x1xf32>
      %127 = arith.addf %90, %126 : vector<1x1xf32>
      %128 = vector.extract_strided_slice %0 {offsets = [0, 0], sizes = [8, 128], strides = [1, 1]} : vector<24x128xf32> to vector<8x128xf32>
      %cst_61 = arith.constant dense<0.000000e+00> : vector<128xf32>
      %129 = vector.multi_reduction <add>, %128, %cst_61 [0] : vector<8x128xf32> to vector<128xf32>
      %130 = vector.shape_cast %129 : vector<128xf32> to vector<1x128xf32>
      %cst_62 = arith.constant 8.000000e+00 : f32
      %131 = vector.broadcast %cst_62 : f32 to vector<1x128xf32>
      %132 = arith.divf %130, %131 : vector<1x128xf32>
      %133 = vector.broadcast %132 : vector<1x128xf32> to vector<8x128xf32>
      %134 = arith.subf %128, %133 : vector<8x128xf32>
      %135 = arith.mulf %134, %134 : vector<8x128xf32>
      %cst_63 = arith.constant dense<0.000000e+00> : vector<128xf32>
      %136 = vector.multi_reduction <add>, %135, %cst_63 [0] : vector<8x128xf32> to vector<128xf32>
      %137 = vector.shape_cast %136 : vector<128xf32> to vector<1x128xf32>
      %cst_64 = arith.constant 7.000000e+00 : f32
      %138 = vector.broadcast %cst_64 : f32 to vector<1x128xf32>
      %139 = arith.divf %137, %138 : vector<1x128xf32>
      %140 = math.sqrt %139 : vector<1x128xf32>
      %cst_65 = arith.constant dense<0.000000e+00> : vector<1xf32>
      %141 = vector.multi_reduction <add>, %140, %cst_65 [1] : vector<1x128xf32> to vector<1xf32>
      %142 = vector.shape_cast %141 : vector<1xf32> to vector<1x1xf32>
      %cst_66 = arith.constant 1.280000e+02 : f32
      %143 = vector.broadcast %cst_66 : f32 to vector<1x1xf32>
      %144 = arith.divf %142, %143 : vector<1x1xf32>
      %cst_67 = arith.constant dense<0.000000e+00> : vector<128xf32>
      %145 = vector.multi_reduction <add>, %2, %cst_67 [0] : vector<8x128xf32> to vector<128xf32>
      %146 = vector.shape_cast %145 : vector<128xf32> to vector<1x128xf32>
      %cst_68 = arith.constant 8.000000e+00 : f32
      %147 = vector.broadcast %cst_68 : f32 to vector<1x128xf32>
      %148 = arith.divf %146, %147 : vector<1x128xf32>
      %149 = vector.broadcast %148 : vector<1x128xf32> to vector<8x128xf32>
      %150 = arith.subf %2, %149 : vector<8x128xf32>
      %151 = arith.mulf %150, %150 : vector<8x128xf32>
      %cst_69 = arith.constant dense<0.000000e+00> : vector<128xf32>
      %152 = vector.multi_reduction <add>, %151, %cst_69 [0] : vector<8x128xf32> to vector<128xf32>
      %153 = vector.shape_cast %152 : vector<128xf32> to vector<1x128xf32>
      %cst_70 = arith.constant 7.000000e+00 : f32
      %154 = vector.broadcast %cst_70 : f32 to vector<1x128xf32>
      %155 = arith.divf %153, %154 : vector<1x128xf32>
      %156 = math.sqrt %155 : vector<1x128xf32>
      %cst_71 = arith.constant dense<0.000000e+00> : vector<1xf32>
      %157 = vector.multi_reduction <add>, %156, %cst_71 [1] : vector<1x128xf32> to vector<1xf32>
      %158 = vector.shape_cast %157 : vector<1xf32> to vector<1x1xf32>
      %cst_72 = arith.constant 1.280000e+02 : f32
      %159 = vector.broadcast %cst_72 : f32 to vector<1x1xf32>
      %160 = arith.divf %158, %159 : vector<1x1xf32>
      %161 = vector.extract_strided_slice %0 {offsets = [8, 0], sizes = [8, 128], strides = [1, 1]} : vector<24x128xf32> to vector<8x128xf32>
      %cst_73 = arith.constant dense<0.000000e+00> : vector<128xf32>
      %162 = vector.multi_reduction <add>, %161, %cst_73 [0] : vector<8x128xf32> to vector<128xf32>
      %163 = vector.shape_cast %162 : vector<128xf32> to vector<1x128xf32>
      %cst_74 = arith.constant 8.000000e+00 : f32
      %164 = vector.broadcast %cst_74 : f32 to vector<1x128xf32>
      %165 = arith.divf %163, %164 : vector<1x128xf32>
      %166 = vector.broadcast %165 : vector<1x128xf32> to vector<8x128xf32>
      %167 = arith.subf %161, %166 : vector<8x128xf32>
      %168 = arith.mulf %167, %167 : vector<8x128xf32>
      %cst_75 = arith.constant dense<0.000000e+00> : vector<128xf32>
      %169 = vector.multi_reduction <add>, %168, %cst_75 [0] : vector<8x128xf32> to vector<128xf32>
      %170 = vector.shape_cast %169 : vector<128xf32> to vector<1x128xf32>
      %cst_76 = arith.constant 7.000000e+00 : f32
      %171 = vector.broadcast %cst_76 : f32 to vector<1x128xf32>
      %172 = arith.divf %170, %171 : vector<1x128xf32>
      %173 = math.sqrt %172 : vector<1x128xf32>
      %cst_77 = arith.constant dense<0.000000e+00> : vector<1xf32>
      %174 = vector.multi_reduction <add>, %173, %cst_77 [1] : vector<1x128xf32> to vector<1xf32>
      %175 = vector.shape_cast %174 : vector<1xf32> to vector<1x1xf32>
      %cst_78 = arith.constant 1.280000e+02 : f32
      %176 = vector.broadcast %cst_78 : f32 to vector<1x1xf32>
      %177 = arith.divf %175, %176 : vector<1x1xf32>
      %178 = tpu.iota {dimensions = array<i32: 1>} : vector<1x8xi32>
      %cst_79 = arith.constant 0.000000e+00 : f32
      %179 = vector.broadcast %cst_79 : f32 to vector<1x8xf32>
      %c0_i32_80 = arith.constant 0 : i32
      %180 = vector.broadcast %c0_i32_80 : i32 to vector<1x8xi32>
      %181 = arith.cmpi eq, %178, %180 : vector<1x8xi32>
      %182 = vector.shape_cast %127 : vector<1x1xf32> to vector<1x1xf32>
      %183 = vector.broadcast %182 : vector<1x1xf32> to vector<1x8xf32>
      %184 = arith.select %181, %183, %179 : vector<1x8xi1>, vector<1x8xf32>
      %c1_i32 = arith.constant 1 : i32
      %185 = vector.broadcast %c1_i32 : i32 to vector<1x8xi32>
      %186 = arith.cmpi eq, %178, %185 : vector<1x8xi32>
      %187 = vector.shape_cast %90 : vector<1x1xf32> to vector<1x1xf32>
      %188 = vector.broadcast %187 : vector<1x1xf32> to vector<1x8xf32>
      %189 = arith.select %186, %188, %184 : vector<1x8xi1>, vector<1x8xf32>
      %c2_i32_81 = arith.constant 2 : i32
      %190 = vector.broadcast %c2_i32_81 : i32 to vector<1x8xi32>
      %191 = arith.cmpi eq, %178, %190 : vector<1x8xi32>
      %192 = vector.shape_cast %95 : vector<1x1xf32> to vector<1x1xf32>
      %193 = vector.broadcast %192 : vector<1x1xf32> to vector<1x8xf32>
      %194 = arith.select %191, %193, %189 : vector<1x8xi1>, vector<1x8xf32>
      %c3_i32 = arith.constant 3 : i32
      %195 = vector.broadcast %c3_i32 : i32 to vector<1x8xi32>
      %196 = arith.cmpi eq, %178, %195 : vector<1x8xi32>
      %197 = vector.shape_cast %126 : vector<1x1xf32> to vector<1x1xf32>
      %198 = vector.broadcast %197 : vector<1x1xf32> to vector<1x8xf32>
      %199 = arith.select %196, %198, %194 : vector<1x8xi1>, vector<1x8xf32>
      %c4_i32 = arith.constant 4 : i32
      %200 = vector.broadcast %c4_i32 : i32 to vector<1x8xi32>
      %201 = arith.cmpi eq, %178, %200 : vector<1x8xi32>
      %202 = vector.shape_cast %107 : vector<1x1xf32> to vector<1x1xf32>
      %203 = vector.broadcast %202 : vector<1x1xf32> to vector<1x8xf32>
      %204 = arith.select %201, %203, %199 : vector<1x8xi1>, vector<1x8xf32>
      %c5_i32 = arith.constant 5 : i32
      %205 = vector.broadcast %c5_i32 : i32 to vector<1x8xi32>
      %206 = arith.cmpi eq, %178, %205 : vector<1x8xi32>
      %207 = vector.shape_cast %144 : vector<1x1xf32> to vector<1x1xf32>
      %208 = vector.broadcast %207 : vector<1x1xf32> to vector<1x8xf32>
      %209 = arith.select %206, %208, %204 : vector<1x8xi1>, vector<1x8xf32>
      %c6_i32 = arith.constant 6 : i32
      %210 = vector.broadcast %c6_i32 : i32 to vector<1x8xi32>
      %211 = arith.cmpi eq, %178, %210 : vector<1x8xi32>
      %212 = vector.shape_cast %160 : vector<1x1xf32> to vector<1x1xf32>
      %213 = vector.broadcast %212 : vector<1x1xf32> to vector<1x8xf32>
      %214 = arith.select %211, %213, %209 : vector<1x8xi1>, vector<1x8xf32>
      %c7_i32 = arith.constant 7 : i32
      %215 = vector.broadcast %c7_i32 : i32 to vector<1x8xi32>
      %216 = arith.cmpi eq, %178, %215 : vector<1x8xi32>
      %217 = vector.shape_cast %177 : vector<1x1xf32> to vector<1x1xf32>
      %218 = vector.broadcast %217 : vector<1x1xf32> to vector<1x8xf32>
      %219 = arith.select %216, %218, %214 : vector<1x8xi1>, vector<1x8xf32>
      %c0_82 = arith.constant 0 : index
      %c0_83 = arith.constant 0 : index
      %220 = vector.load %arg4[%c0_82, %c0_83] : memref<1x8xf32, #tpu.memory_space<vmem>>, vector<1x8xf32>
      tpu.vector_store %arg4[%c0_82, %c0_83], %219 {strides = array<i32>} : memref<1x8xf32, #tpu.memory_space<vmem>>, vector<1x8xf32>,
    } else {
    }
    return
  }
  func.func @transform_0(%arg0: i32) -> (i32, i32) {
    %c0_i32 = arith.constant 0 : i32
    %c0_i32_0 = arith.constant 0 : i32
    %c0_i32_1 = arith.constant 0 : i32
    return %c0_i32, %c0_i32_0 : i32, i32
  }
  func.func @transform_1(%arg0: i32) -> (i32, i32) {
    %c0_i32 = arith.constant 0 : i32
    %c0_i32_0 = arith.constant 0 : i32
    return %c0_i32, %arg0 : i32, i32
  }
  func.func @transform_2(%arg0: i32) -> (i32, i32) {
    %c0_i32 = arith.constant 0 : i32
    %c0_i32_0 = arith.constant 0 : i32
    return %c0_i32, %arg0 : i32, i32
  }
  func.func @transform_3(%arg0: i32) -> (i32, i32) {
    %c0_i32 = arith.constant 0 : i32
    %c0_i32_0 = arith.constant 0 : i32
    %c0_i32_1 = arith.constant 0 : i32
    return %c0_i32, %c0_i32_0 : i32, i32
  }
}

</mosaic_0001>

<bundles_post_ra>
// kernel: _forward_jit.2
= control target key start
LH: loop header
LB: loop body
LE: loop exit
PB: predicated region body
PF: predicated region fallthrough
CT: control target
= control target key end

     0   :  { %s687_s15 = smov 0   ;;  %s754_s0 = inlined_call_operand.vmem [shape: bf16[192,128], index: 0, kind: input, shape index: {}]   ;;  %s755_s1 = inlined_call_operand.vmem [shape: bf16[192,1], index: 1, kind: input, shape index: {}]   ;;  %s756_s2 = inlined_call_operand.vmem [shape: f32[24,1], index: 2, kind: input, shape index: {}]   ;;  %s757_s3 = inlined_call_operand.vmem [shape: bf16[128,128], index: 3, kind: input, shape index: {}]   ;;  %s758_s4 = inlined_call_operand.vmem [shape: f32[24,128], index: 4, kind: output, shape index: {}]  }
   0x1 LB: > { %s561_s16 = sadd.s32 4294967295, %s657_s15   ;;  %p565_p0 = scmp.ge.s32.totalorder %s657_s15, 1  ;;  %s657_s15 = sphi %s687_s15, %s14_s15  }
   0x2   : > { %p183_p1 = scmp.lt.s32.totalorder %s657_s15, 4 }
   0x4   : > { %p184_p2 = pnand %p565_p0, %p183_p1 }
   0x5   : > { %s566_s17 = sshll.u32 (!%p184_p2), %s561_s16, 3  ;;  %p229_p4 = scmp.lt.s32.totalorder (!%p184_p2), %s561_s16, 2 }
   0x6   : > { %187 = sbr.rel (%p184_p2) target bundleno = 558 (0x22e), region = 36  ;;  %p218_p3 = scmp.lt.s32.totalorder (!%p184_p2), %s566_s17, 23 }
   0xb   : > { %v659_v0 = vmov 0   ;;  %s760_s17 = smov (!%p218_p3, %s566_s17), 23  ;;  %s762_s16 = smov (!%p229_p4, %s561_s16), 2  ;;  %v660_v10 = vmov 839922192   ;;  %v615_v15 = vld [vmem:[%s757_s3 + $0x38] sm:$0xff]  ;;  %v354_v18 = vlaneseq }
   0xc   : > { %647 = vset.pattern.permute.xlu1 %v659_v0  ;;  %646 = vset.pattern.permute.xlu0 %v659_v0  ;;  %s567_s18 = sshll.u32 %s760_s17, 2  ;;  %s570_s22 = sshll.u32 %s762_s16, 3  ;;  %v260_v11 = vunpack.c.l.s4 %v660_v10  ;;  %v614_v17 = vld [vmem:[%s757_s3 + $0x30] sm:$0xff]  ;;  %v613_v21 = vld [vmem:[%s757_s3 + $0x28] sm:$0xff]  ;;  %v612_v36 = vld [vmem:[%s757_s3 + $0x20] sm:$0xff]  ;;  %vm366_vm3 = vcmask 523264  }
   0xd   : > { %648 = vset.pattern.permute.xlu2 %v659_v0  ;;  %s227_s21 = scalar_lea.vmem %s755_s1, %s567_s18  ;;  %s232_s25 = scalar_lea.vmem %s756_s2, %s570_s22  ;;  %455 = vmatpush.bf16.msra.mxu1 %v615_v15  ;;  %v355_v22 = vshrl.u32 %v354_v18, 7  ;;  %v357_v49 = vand.u32 127, %v354_v18  ;;  %v611_v50 = vld [vmem:[%s757_s3 + $0x18] sm:$0xff]  ;;  %v610_v0 = vld [vmem:[%s757_s3 + $0x10] sm:$0xff] }
   0xe   : > { %v252_v1 = vld [vmem:[%s227_s21 + $0x18] sm:$0xf]  ;;  %v250_v2 = vld [vmem:[%s227_s21 + $0x10] sm:$0xf]  ;;  %v248_v3 = vld [vmem:[%s227_s21 + $0x8] sm:$0xf]  ;;  %v261_v16 = vunpack.c.0.s8 %v260_v11  ;;  %s719_s30 = scalar_lea.vmem %s754_s0, %s567_s18  ;;  %s236_s24 = scalar_lea.vmem %s758_s4, %s570_s22 }
   0xf   : > { %310 = vperm.xlu0 %646, %v252_v1   ;;  %292 = vperm.xlu1 %647, %v250_v2   ;;  %v253_v4 = vld [vmem:[%s227_s21 + $0x1c] sm:$0xf]  ;;  %v251_v5 = vld [vmem:[%s227_s21 + $0x14] sm:$0xf]  ;;  %v249_v6 = vld [vmem:[%s227_s21 + $0xc] sm:$0xf] }
  0x10   : > { %274 = vperm.xlu2 %648, %v248_v3   ;;  %v247_v7 = vld [vmem:[%s227_s21 + $0x4] sm:$0xf]  ;;  %v246_v8 = vld [vmem:[%s227_s21] sm:$0xf]  ;;  %v634_v20 = vld [vmem:[%s719_s30 + $0x18] sm:$0xff]   ;;  %v358_v40 = vmul.u32 8, %v355_v22 }
  0x11   : > { %v383_v9 = vld [vmem:[%s232_s25] sm:$0xff]  ;;  %456 = vmatpush.bf16.msra.mxu1 %v614_v17  ;;  %v630_v26 = vunpack.c.l.bf16 %v634_v20  ;;  %v631_v27 = vunpack.c.h.bf16 %v634_v20  ;;  %v632_v28 = vld [vmem:[%s719_s30 + $0x8] sm:$0xff]   ;;  %v633_v30 = vld [vmem:[%s719_s30 + $0x10] sm:$0xff]  }
  0x12   : > { %v627_v38 = vunpack.c.h.bf16 %v633_v30  ;;  %v622_v41 = vunpack.c.l.bf16 %v632_v28  ;;  %v626_v42 = vunpack.c.l.bf16 %v633_v30  ;;  %v623_v47 = vunpack.c.h.bf16 %v632_v28  ;;  %v617_v52 = vld [vmem:[%s719_s30] sm:$0xff]  }
  0x13   : > { %v360_v54 = vadd.s32 8, %v358_v40  ;;  %v619_v62 = vunpack.c.h.bf16 %v617_v52  ;;  %v618_v63 = vunpack.c.l.bf16 %v617_v52  ;;  %vm359_vm0 = vcmp.ge.s32.totalorder %v357_v49, %v358_v40 }
  0x15   : > { %457 = vmatpush.bf16.msra.mxu1 %v613_v21  ;;  %vm361_vm1 = vcmp.lt.s32.totalorder %v357_v49, %v360_v54 }
  0x16   : > { %vm362_vm2 = vmand %vm359_vm0, %vm361_vm1 }
  0x17   : > { %319 = vperm.xlu0 %646, %v253_v4   ;;  %301 = vperm.xlu1 %647, %v251_v5   ;;  %v609_v4 = vld [vmem:[%s757_s3 + $0x8] sm:$0xff] }
  0x18   : > { %283 = vperm.xlu2 %648, %v249_v6  }
  0x19   : > { %458 = vmatpush.bf16.msra.mxu1 %v612_v36 }
  0x1d   : > { %459 = vmatpush.bf16.msra.mxu1 %v611_v50 }
  0x1f   : > { %265 = vperm.xlu1 %647, %v247_v7   ;;  %256 = vperm.xlu0 %646, %v246_v8   ;;  %v661_v8 = vmov 0.0  }
  0x20   : > { %386 = vperm.xlu2 %648, %v383_v9   ;;  %v572_v9 = vsel %vm362_vm2, 1.0, %v661_v8 }
  0x21   : > { %460 = vmatpush.bf16.msra.mxu1 %v610_v0  ;;  %v365_v11 = vpack.c.bf16 %v572_v9, %v572_v9 }
  0x25   : > { %461 = vmatpush.bf16.msra.mxu1 %v609_v4 }
  0x6a   : > { %v275_v12 = vpop.permute.xlu2 %274 }
  0x6b   : > { %v280_v23 = vperm.slane %v275_v12, %v261_v16  ;;  %v608_v12 = vld [vmem:[%s757_s3] sm:$0xff] }
  0x6c   : > { %462 = vmatpush.bf16.msra.mxu1 %v608_v12 }
  0x6d   : > { %v336_v43 = vunpack.c.l.bf16 %v280_v23 }
  0x6f   : > { %v344_v57 = vmul.f32 %v622_v41, %v336_v43 }
  0x72   : > { %v284_v32 = vpop.permute.xlu2 %283 }
  0x73   : > { %v289_v35 = vperm.slane %v284_v32, %v261_v16 }
  0x75   : > { %v337_v48 = vunpack.c.l.bf16 %v289_v35 }
  0x77   : > { %v345_v61 = vmul.f32 %v623_v47, %v337_v48 }
  0x79   : > { %v351_v7 = vpack.c.bf16 %v345_v61, %v344_v57 }
  0x81   : > { %v311_v13 = vpop.permute.xlu0 %310  ;;  %v293_v14 = vpop.permute.xlu1 %292 }
  0x82   : > { %v316_v19 = vperm.slane %v311_v13, %v261_v16  ;;  %v298_v31 = vperm.slane %v293_v14, %v261_v16  ;;  %v387_v13 = vpop.permute.xlu2 %386 }
  0x84   : > { %v340_v29 = vunpack.c.l.bf16 %v316_v19  ;;  %v338_v44 = vunpack.c.l.bf16 %v298_v31 }
  0x86   : > { %v348_v45 = vmul.f32 %v630_v26, %v340_v29  ;;  %v346_v58 = vmul.f32 %v626_v42, %v338_v44 }
  0x89   : > { %v320_v24 = vpop.permute.xlu0 %319  ;;  %v302_v25 = vpop.permute.xlu1 %301 }
  0x8a   : > { %v325_v33 = vperm.slane %v320_v24, %v261_v16  ;;  %v307_v34 = vperm.slane %v302_v25, %v261_v16 }
  0x8c   : > { %v341_v37 = vunpack.c.l.bf16 %v325_v33  ;;  %v339_v39 = vunpack.c.l.bf16 %v307_v34 }
  0x8e   : > { %v349_v46 = vmul.f32 %v631_v27, %v341_v37  ;;  %v347_v51 = vmul.f32 %v627_v38, %v339_v39 }
  0x90   : > { %v353_v53 = vpack.c.bf16 %v349_v46, %v348_v45  ;;  %v352_v3 = vpack.c.bf16 %v347_v51, %v346_v58 }
  0x91   : > { %v266_v55 = vpop.permute.xlu1 %265  ;;  %v257_v56 = vpop.permute.xlu0 %256 }
  0x92   : > { %v271_v59 = vperm.slane %v266_v55, %v261_v16  ;;  %v262_v60 = vperm.slane %v257_v56, %v261_v16  ;;  %374 = vmatpush.bf16.msra.mxu0 %v353_v53 }
  0x94   : > { %v335_v1 = vunpack.c.l.bf16 %v271_v59  ;;  %v334_v2 = vunpack.c.l.bf16 %v262_v60 }
  0x96   : > { %375 = vmatpush.bf16.msra.mxu0 %v352_v3  ;;  %v343_v5 = vmul.f32 %v619_v62, %v335_v1  ;;  %v342_v6 = vmul.f32 %v618_v63, %v334_v2 }
  0x98   : > { %v350_v10 = vpack.c.bf16 %v343_v5, %v342_v6 }
  0x9a   : > { %376 = vmatpush.bf16.msra.mxu0 %v351_v7 }
  0x9e   : > { %377 = vmatpush.bf16.msra.mxu0 %v350_v10 }
  0xa1   : > { %573 = vmatmul.msk.bf16.vlgmr.msra.gmra.mxu0 %vm366_vm3, %v365_v11 }
 0x11e   : > { %v379_v14 = vpop.f32.mrf.mxu0 }
 0x11f   : > { %v389_v15 = vmul.f32 %v387_v13, %v379_v14 }
 0x121   : > { %v390_v16 = vpack.c.bf16 %v389_v15, %v389_v15 }
 0x123   : > { %463 = vmatmul.bf16.vlgmr.msra.gmra.mxu1 %v390_v16 }
 0x126   : > { %v381_v17 = vpop.f32.mrf.mxu0 }
 0x1a0   : > { %v464_v18 = vpop.f32.mrf.mxu1 }
 0x1a1   : > { %v468_v19 = vmul.f32 %v464_v18, %v464_v18 }
 0x1a3   : > { %469 = vadd.xlane.f32.xlu0 %v468_v19 }
 0x1a8   : > { %v466_v20 = vpop.f32.mrf.mxu1 }
 0x216   : > { %v470_v21 = vpop.xlane.xlu0 %469 }
 0x217   : > { %v471_v22 = vmax.f32 %v470_v21, 1e-24 }
 0x219   : > { %649 = vrsqrt.f32 %v471_v22  ;;  %vm478_vm5 = vweird.f32 %v471_v22 }
 0x21f   : > { %v650_v23 = vpop.eup %649 }
 0x220   : > { %v473_v24 = vmul.f32 %v650_v23, %v471_v22  ;;  %vm479_vm4 = vweird.f32 %v650_v23 }
 0x221   : > { %vm480_vm6 = vmor %vm478_vm5, %vm479_vm4 }
 0x222   : > { %v474_v25 = vmul.f32 %v650_v23, %v473_v24 }
 0x224   : > { %v475_v26 = vmul.f32 0.5, %v474_v25 }
 0x226   : > { %v476_v27 = vsub.f32 1.5, %v475_v26 }
 0x228   : > { %v477_v28 = vmul.f32 %v650_v23, %v476_v27 }
 0x22a   : > { %v481_v29 = vsel %vm480_vm6, %v650_v23, %v477_v28 }
 0x22b   : > { %v482_v30 = vmul.f32 %v481_v29, %v464_v18 }
 0x22d   : > { %483 = vst [vmem:[%s236_s24] sm:$0xff] %v482_v30 }
 0x22e PF: > { %s14_s15 = sadd.s32 1, %s657_s15  }
 0x22f   : > { %p11_p5 = scmp.ge.s32.totalorder %s14_s15, 5  }
 0x231   :  { %13 = sbr.rel (!%p11_p5) target bundleno = 1 (0x1), region = 72 }

// kernel: _forward_jit.3
= control target key start
LH: loop header
LB: loop body
LE: loop exit
PB: predicated region body
PF: predicated region fallthrough
CT: control target
= control target key end

     0   :  { %9 = vsyncpa [#allocation9], 0  ;;  %s1296_s0 = inlined_call_operand.vmem [shape: f32[24,128], index: 0, kind: input, shape index: {}]   ;;  %s1297_s1 = inlined_call_operand.vmem [shape: bf16[128,384], index: 1, kind: input, shape index: {}]   ;;  %s1298_s2 = inlined_call_operand.hbm [shape: f32[8,384], index: 2, kind: output, shape index: {0}]   ;;  %s1299_s3 = inlined_call_operand.vmem [shape: f32[1,8], index: 3, kind: output, shape index: {1}]  }
   0x1   :  { %11 = vsyncpa [#allocation9 + $0x1], 0  ;;  %s1058_s12 = smov 0   ;;  %s1060_s13 = smov 0  }
   0x2   :  { %s1062_s14 = smov 0   ;;  %s1064_s15 = smov 0  }
   0x3 LB: > { %s1079_s16 = sadd.s32 4294967295, %s1026_s15   ;;  %s824_s17 = sadd.s32 4294967294, %s1026_s15   ;;  %s1026_s15 = sphi %s1064_s15, %s1305_s15   ;;  %s1022_s14 = sphi %s1062_s14, %s1304_s14   ;;  %s1018_s13 = sphi %s1060_s13, %s1303_s13   ;;  %s1014_s12 = sphi %s1058_s12, %s1302_s12  }
   0x4   : > { %s1083_s18 = sadd.s32 1, %s1026_s15   ;;  %s45_s19 = sadd.s32 1, %s1022_s14 }
   0x5   : > { %s42_s20 = ssub.s32 %s1026_s15, %s1083_s18  ;;  %p52_p0 = scmp.ne.s32.totalorder %s1022_s14, %s1018_s13 }
   0x6   : > { %p43_p1 = scmp.eq.s32.totalorder %s42_s20, 0  ;;  %p53_p2 = scmp.eq.s32.totalorder %s1026_s15, 0 }
   0x7   : > { %p82_p3 = scmp.eq.s32.totalorder %s1079_s16, 2  ;;  %p87_p4 = scmp.ne.s32.totalorder %s1018_s13, %s1014_s12 }
   0x8   : > { %s1095_s21 = scalar_select %p43_p1, %s1022_s14, %s45_s19  }
   0x9   : > { %p54_p5 = por %p53_p2, %p52_p0  ;;  %p1097_p6 = por %p82_p3, %p52_p0 }
   0xa   : > { %p88_p7 = scmp.eq.s32.totalorder %s824_s17, 2  ;;  %p826_p9 = scmp.ge.s32.totalorder %s1026_s15, 3 }
   0xc   : > { %p1101_p8 = por %p88_p7, %p87_p4  ;;  %128 = sbr.rel (%p826_p9) target bundleno = 37 (0x25), region = 20 }
  0x11   : > { %131 = sbr.rel (!%p54_p5) target bundleno = 37 (0x25), region = 24  ;;  %s133_s24 = sand.u32 (%p54_p5), 1, %s1022_s14  }
  0x12   : > { %s828_s25 = sshll.u32 (%p54_p5), %s1026_s15, 2  ;;  %s827_s26 = sshll.u32 (%p54_p5), %s133_s24, 6 }
  0x13   : > { %s1111_s29 = scalar_lea.vmem (%p54_p5), %s1297_s1, %s828_s25  ;;  %s135_s30 = scalar_lea.vmem (%p54_p5), [#allocation7], %s827_s26 }
  0x14   : > { %v154_v0 = vld [vmem:[%s1111_s29] sm:$0xf] (%p54_p5)  ;;  %v156_v1 = vld [vmem:[%s1111_s29 + $0xc] sm:$0xf] (%p54_p5)  ;;  %v158_v2 = vld [vmem:[%s1111_s29 + $0x18] sm:$0xf] (%p54_p5) }
  0x15   : > { %155 = vst [vmem:[%s135_s30] sm:$0xf] (%p54_p5), %v154_v0  ;;  %v160_v3 = vld [vmem:[%s1111_s29 + $0x24] sm:$0xf] (%p54_p5)  ;;  %v162_v4 = vld [vmem:[%s1111_s29 + $0x30] sm:$0xf] (%p54_p5) }
  0x16   : > { %157 = vst [vmem:[%s135_s30 + $0x4] sm:$0xf] %v156_v1  ;;  %v164_v5 = vld [vmem:[%s1111_s29 + $0x3c] sm:$0xf]  ;;  %v166_v6 = vld [vmem:[%s1111_s29 + $0x48] sm:$0xf] }
  0x17   : > { %159 = vst [vmem:[%s135_s30 + $0x8] sm:$0xf] %v158_v2  ;;  %v168_v7 = vld [vmem:[%s1111_s29 + $0x54] sm:$0xf]  ;;  %v170_v8 = vld [vmem:[%s1111_s29 + $0x60] sm:$0xf] }
  0x18   : > { %161 = vst [vmem:[%s135_s30 + $0xc] sm:$0xf] %v160_v3  ;;  %v172_v9 = vld [vmem:[%s1111_s29 + $0x6c] sm:$0xf]  ;;  %v174_v10 = vld [vmem:[%s1111_s29 + $0x78] sm:$0xf] }
  0x19   : > { %163 = vst [vmem:[%s135_s30 + $0x10] sm:$0xf] %v162_v4  ;;  %v176_v11 = vld [vmem:[%s1111_s29 + $0x84] sm:$0xf]  ;;  %v178_v12 = vld [vmem:[%s1111_s29 + $0x90] sm:$0xf] }
  0x1a   : > { %165 = vst [vmem:[%s135_s30 + $0x14] sm:$0xf] %v164_v5  ;;  %v180_v13 = vld [vmem:[%s1111_s29 + $0x9c] sm:$0xf]  ;;  %v182_v14 = vld [vmem:[%s1111_s29 + $0xa8] sm:$0xf] }
  0x1b   : > { %167 = vst [vmem:[%s135_s30 + $0x18] sm:$0xf] %v166_v6  ;;  %v184_v15 = vld [vmem:[%s1111_s29 + $0xb4] sm:$0xf] }
  0x1c   : > { %169 = vst [vmem:[%s135_s30 + $0x1c] sm:$0xf] %v168_v7 }
  0x1d   : > { %171 = vst [vmem:[%s135_s30 + $0x20] sm:$0xf] %v170_v8 }
  0x1e   : > { %173 = vst [vmem:[%s135_s30 + $0x24] sm:$0xf] %v172_v9 }
  0x1f   : > { %175 = vst [vmem:[%s135_s30 + $0x28] sm:$0xf] %v174_v10 }
  0x20   : > { %177 = vst [vmem:[%s135_s30 + $0x2c] sm:$0xf] %v176_v11 }
  0x21   : > { %179 = vst [vmem:[%s135_s30 + $0x30] sm:$0xf] %v178_v12 }
  0x22   : > { %181 = vst [vmem:[%s135_s30 + $0x34] sm:$0xf] %v180_v13 }
  0x23   : > { %183 = vst [vmem:[%s135_s30 + $0x38] sm:$0xf] %v182_v14 }
  0x24   : > { %185 = vst [vmem:[%s135_s30 + $0x3c] sm:$0xf] %v184_v15 }
  0x25 PF: > { %p829_p10 = scmp.ge.s32.totalorder %s1026_s15, 1  ;;  %p240_p11 = scmp.lt.s32.totalorder %s1026_s15, 4 }
  0x27   : > { %p241_p12 = pnand %p829_p10, %p240_p11 }
  0x28   : > { %s1132_s4 = sand.u32 (!%p241_p12), 1, %s1018_s13   ;;  %p832_p13 = scmp.ne.s32.totalorder (!%p241_p12), %s1079_s16, 0 }
  0x29   : > { %244 = sbr.rel (%p241_p12) target bundleno = 926 (0x39e), region = 65  ;;  %s830_s11 = sshll.u32 (!%p241_p12), %s1132_s4, 6 }
  0x2a   : > { %s831_s17 = sshll.u32 (!%p241_p12), %s1132_s4, 3  ;;  %s1151_s19 = scalar_lea.vmem (!%p241_p12), [#allocation7], %s830_s11 }
  0x2b   : > { %s1153_s20 = scalar_lea.vmem (!%p241_p12), [#allocation8], %s831_s17 }
  0x2e   : > { %v1137_v16 = vld [vmem:[%s1296_s0] sm:$0xff]  ;;  %v1142_v17 = vld [vmem:[%s1296_s0 + $0x8] sm:$0xff]  ;;  %v1147_v18 = vld [vmem:[%s1296_s0 + $0x10] sm:$0xff]  ;;  %276 = sbr.rel (%p832_p13) target bundleno = 180 (0xb4), region = 73 }
  0x33   : > { %v285_v19 = vmul.f32 %v1147_v18, %v1137_v16  ;;  %v290_v20 = vmul.f32 %v1147_v18, %v1142_v17  ;;  %vm277_vm0 = vcmask 7168   ;;  %v1028_v21 = vmov -inf  }
  0x34   : > { %278 = vst.msk [vmem:[#allocation2] sm:$0xff] %vm277_vm0, %v1028_v21  ;;  %v1029_v22 = vmov 0.0  }
  0x35   : > { %286 = vadd.xlane.f32.xlu0 %v285_v19  ;;  %279 = vst.msk [vmem:[#allocation2 + $0x8] sm:$0xff] %vm277_vm0, %v1028_v21 }
  0x36   : > { %280 = vst.msk [vmem:[#allocation3] sm:$0xff] %vm277_vm0, %v1029_v22 }
  0x37   : > { %281 = vst.msk [vmem:[#allocation3 + $0x8] sm:$0xff] %vm277_vm0, %v1029_v22 }
  0x38   : > { %282 = vst.msk [vmem:[#allocation4] sm:$0xff] %vm277_vm0, %v1029_v22 }
  0x39   : > { %283 = vst.msk [vmem:[#allocation4 + $0x8] sm:$0xff] %vm277_vm0, %v1029_v22 }
  0x3a   : > { %284 = vst.msk [vmem:[#allocation5] sm:$0xff] %vm277_vm0, %v1029_v22 }
  0x3d   : > { %291 = vadd.xlane.f32.xlu0 %v290_v20 }
  0xa8   : > { %v287_v23 = vpop.xlane.xlu0 %286 }
  0xa9   : > { %v288_v24 = vmul.f32 20.0, %v287_v23 }
  0xab   : > { %289 = vst.msk [vmem:[#allocation6] sm:$0xff] %vm277_vm0, %v288_v24 }
  0xb0   : > { %v292_v25 = vpop.xlane.xlu0 %291 }
  0xb1   : > { %v293_v26 = vmul.f32 20.0, %v292_v25 }
  0xb3   : > { %294 = vst.msk [vmem:[#allocation6 + $0x8] sm:$0xff] %vm277_vm0, %v293_v26 }
  0xb4 PF: > { %v881_v27 = vld [vmem:[%s1151_s19 + $0x38] sm:$0xff]  ;;  %v880_v28 = vld [vmem:[%s1151_s19 + $0x30] sm:$0xff]  ;;  %v1030_v29 = vmov 0   ;;  %v879_v31 = vld [vmem:[%s1151_s19 + $0x28] sm:$0xff]  ;;  %v297_v38 = vpack.c.bf16 %v1142_v17, %v1137_v16  ;;  %v379_v39 = vlaneseq  ;;  %s865_s24 = sshll.u32 %s1079_s16, 7  ;;  %v1031_v47 = vmov 0.0  }
  0xb5   : > { %362 = vmatpush.bf16.msra.mxu0 %v881_v27  ;;  %931 = vset.pattern.permute.xlu0 %v1030_v29  ;;  %v1162_v30 = vld [vmem:[#allocation6] sm:$0xff]  ;;  %v878_v33 = vld [vmem:[%s1151_s19 + $0x20] sm:$0xff]  ;;  %v877_v34 = vld [vmem:[%s1151_s19 + $0x18] sm:$0xff]  ;;  %v381_v41 = vstv %s865_s24  ;;  %vm446_vm3 = vcmask 7168   ;;  %p867_p0 = scmp.ne.s32.totalorder %s1079_s16, 2 }
  0xb6   : > { %388 = vperm.xlu0 %931, %v1162_v30   ;;  %932 = vset.pattern.permute.xlu2 %v1030_v29  ;;  %v876_v35 = vld [vmem:[%s1151_s19 + $0x10] sm:$0xff]  ;;  %v875_v36 = vld [vmem:[%s1151_s19 + $0x8] sm:$0xff]  ;;  %v874_v37 = vld [vmem:[%s1151_s19] sm:$0xff]  ;;  %v1177_v40 = vand.u32 127, %v379_v39 }
  0xb7   : > { %v406_v63 = vld [vmem:[#allocation2] sm:$0xff]  ;;  %v407_v3 = vld [vmem:[#allocation2 + $0x8] sm:$0xff]  ;;  %v420_v27 = vld [vmem:[#allocation3] sm:$0xff] }
  0xb8   : > { %v382_v42 = vadd.s32 %v381_v41, %v1177_v40  ;;  %v450_v7 = vld [vmem:[#allocation4 + $0x8] sm:$0xff]  ;;  %v449_v21 = vld [vmem:[#allocation4] sm:$0xff] }
  0xb9   : > { %363 = vmatpush.bf16.msra.mxu0 %v880_v28 }
  0xba   : > { %v1166_v32 = vld [vmem:[#allocation6 + $0x8] sm:$0xff]  ;;  %vm383_vm1 = vcmp.eq.s32.totalorder %v382_v42, 0  ;;  %vm400_vm2 = vcmp.le.s32.totalorder %v382_v42, 256 }
  0xbb   : > { %v866_v48 = vsel %vm400_vm2, 1.0, %v1031_v47 }
  0xbd   : > { %364 = vmatpush.bf16.msra.mxu0 %v879_v31 }
  0xbe   : > { %393 = vperm.xlu0 %931, %v1166_v32  }
  0xc1   : > { %365 = vmatpush.bf16.msra.mxu0 %v878_v33 }
  0xc5   : > { %366 = vmatpush.bf16.msra.mxu0 %v877_v34  ;;  %v421_v34 = vld [vmem:[#allocation3 + $0x8] sm:$0xff] }
  0xc9   : > { %367 = vmatpush.bf16.msra.mxu0 %v876_v35 }
  0xcd   : > { %368 = vmatpush.bf16.msra.mxu0 %v875_v36 }
  0xd1   : > { %369 = vmatpush.bf16.msra.mxu0 %v874_v37 }
  0xd4   : > { %370 = vmatmul.bf16.vlgmr.msra.gmra.mxu0 %v297_v38  ;;  %v467_v38 = vld [vmem:[#allocation5] sm:$0xff] }
 0x128   : > { %v389_v43 = vpop.permute.xlu0 %388 }
 0x129   : > { %v396_v44 = vsel %vm383_vm1, %v389_v43, 0.0 }
 0x130   : > { %v394_v52 = vpop.permute.xlu0 %393 }
 0x131   : > { %v397_v55 = vsel %vm383_vm1, %v394_v52, 0.0 }
 0x151   : > { %v371_v45 = vpop.f32.mrf.mxu0 }
 0x152   : > { %v376_v46 = vmul.f32 20.0, %v371_v45 }
 0x154   : > { %v398_v49 = vadd.f32 %v396_v44, %v376_v46 }
 0x156   : > { %472 = vst [vmem:[%s1153_s20] sm:$0xff] %v398_v49  ;;  %v404_v50 = vsel %vm400_vm2, %v398_v49, -inf  ;;  %v451_v51 = vmul.f32 %v866_v48, %v398_v49 }
 0x157   : > { %408 = vmax.xlane.f32.xlu1 %v404_v50 }
 0x159   : > { %v373_v53 = vpop.f32.mrf.mxu0 }
 0x15a   : > { %v377_v54 = vmul.f32 20.0, %v373_v53 }
 0x15c   : > { %v399_v56 = vadd.f32 %v397_v55, %v377_v54 }
 0x15e   : > { %v405_v57 = vsel %vm400_vm2, %v399_v56, -inf  ;;  %v463_v58 = vsub.f32 %v398_v49, %v399_v56  ;;  %v452_v62 = vmul.f32 %v866_v48, %v399_v56 }
 0x15f   : > { %410 = vmax.xlane.f32.xlu1 %v405_v57 }
 0x160   : > { %v464_v59 = vsub.f32 2.0, %v463_v58 }
 0x162   : > { %v465_v60 = vmax.f32 %v464_v59, 0.0 }
 0x164   : > { %v466_v61 = vmul.f32 %v866_v48, %v465_v60 }
 0x167   : > { %455 = vadd.xlane.f32.xlu1 %v452_v62 }
 0x1ca   : > { %v409_v0 = vpop.xlane.xlu1 %408 }
 0x1cb   : > { %v412_v1 = vmax.f32 %v406_v63, %v409_v0 }
 0x1cd   : > { %v414_v2 = vsub.f32 %v406_v63, %v412_v1  ;;  %461 = vst.msk [vmem:[#allocation2] sm:$0xff] %vm446_vm3, %v412_v1  ;;  %426 = vperm.xlu2 %932, %v412_v1  }
 0x1cf   : > { %v416_v24 = vmul.f32 1.442695, %v414_v2 }
 0x1d2   : > { %v411_v4 = vpop.xlane.xlu1 %410 }
 0x1d3   : > { %v413_v5 = vmax.f32 %v407_v3, %v411_v4 }
 0x1d5   : > { %v415_v6 = vsub.f32 %v407_v3, %v413_v5  ;;  %462 = vst.msk [vmem:[#allocation2 + $0x8] sm:$0xff] %vm446_vm3, %v413_v5  ;;  %431 = vperm.xlu2 %932, %v413_v5  }
 0x1d7   : > { %v418_v25 = vmul.f32 1.442695, %v415_v6 }
 0x1da   : > { %v456_v8 = vpop.xlane.xlu1 %455 }
 0x1db   : > { %v458_v9 = vadd.f32 %v456_v8, %v450_v7 }
 0x1dd   : > { %460 = vst.msk [vmem:[#allocation4 + $0x8] sm:$0xff] %vm446_vm3, %v458_v9 }
 0x1fe   : > { %453 = vadd.xlane.f32.xlu2 %v451_v51 }
 0x227   : > { %v427_v10 = vpop.permute.xlu2 %426 }
 0x228   : > { %v434_v11 = vsub.f32 %v404_v50, %v427_v10 }
 0x22a   : > { %v436_v12 = vmul.f32 1.442695, %v434_v11 }
 0x22c   : > { %933 = vpow2.f32 %v436_v12 }
 0x22f   : > { %v432_v13 = vpop.permute.xlu2 %431 }
 0x230   : > { %v435_v14 = vsub.f32 %v405_v57, %v432_v13 }
 0x232   : > { %v934_v15 = vpop.eup %933  ;;  %v438_v19 = vmul.f32 1.442695, %v435_v14 }
 0x233   : > { %440 = vadd.xlane.f32.xlu0 %v934_v15 }
 0x234   : > { %935 = vpow2.f32 %v438_v19 }
 0x235   : > { %937 = vpow2.f32 %v416_v24 }
 0x236   : > { %939 = vpow2.f32 %v418_v25 }
 0x23a   : > { %v936_v20 = vpop.eup %935 }
 0x23b   : > { %442 = vadd.xlane.f32.xlu1 %v936_v20  ;;  %v938_v26 = vpop.eup %937 }
 0x23c   : > { %v422_v28 = vmul.f32 %v938_v26, %v420_v27  ;;  %v940_v33 = vpop.eup %939 }
 0x23d   : > { %v423_v35 = vmul.f32 %v940_v33, %v421_v34 }
 0x243   : > { %468 = vadd.xlane.f32.xlu1 %v466_v61 }
 0x271   : > { %v454_v22 = vpop.xlane.xlu2 %453 }
 0x272   : > { %v457_v23 = vadd.f32 %v454_v22, %v449_v21 }
 0x274   : > { %459 = vst.msk [vmem:[#allocation4] sm:$0xff] %vm446_vm3, %v457_v23 }
 0x2a6   : > { %v441_v29 = vpop.xlane.xlu0 %440 }
 0x2a7   : > { %v444_v31 = vadd.f32 %v441_v29, %v422_v28 }
 0x2a9   : > { %447 = vst.msk [vmem:[#allocation3] sm:$0xff] %vm446_vm3, %v444_v31 }
 0x2ae   : > { %v443_v36 = vpop.xlane.xlu1 %442 }
 0x2af   : > { %v445_v37 = vadd.f32 %v443_v36, %v423_v35 }
 0x2b1   : > { %448 = vst.msk [vmem:[#allocation3 + $0x8] sm:$0xff] %vm446_vm3, %v445_v37 }
 0x2b5   : > { %476 = sbr.rel (%p867_p0) target bundleno = 911 (0x38f), region = 77 }
 0x2b6   : > { %v469_v39 = vpop.xlane.xlu1 %468 }
 0x2b7   : > { %v470_v41 = vadd.f32 %v469_v39, %v467_v38 }
 0x2b9   : > { %471 = vst.msk [vmem:[#allocation5] sm:$0xff] %vm446_vm3, %v470_v41 }
 0x2ba   : > { %v477_v42 = vld [vmem:[#allocation2] sm:$0xff]  ;;  %v479_v43 = vld [vmem:[#allocation3] sm:$0xff]  ;;  %v1032_v44 = vmov 0   ;;  %v587_v45 = vrot.slane %v1137_v16, 4  ;;  %v1195_v46 = vld [vmem:[#allocation2 + $0x8] sm:$0xff]  ;;  %v1033_v47 = vmov 8.0  }
 0x2bb   : > { %941 = vset.pattern.permute.xlu0 %v1032_v44  ;;  %944 = vlog2.f32 %v479_v43  ;;  %943 = vset.pattern.permute.xlu2 %v1032_v44  ;;  %v632_v48 = vrot.slane %v1147_v18, 4  ;;  %v663_v49 = vrot.slane %v1142_v17, 4  ;;  %vm520_vm4 = vcmp.ge.f32.partialorder %v1162_v30, %v477_v42  ;;  %v491_v51 = vld [vmem:[#allocation4] sm:$0xff] }
 0x2bc   : > { %946 = vrcp.f32 %v1033_v47  ;;  %942 = vset.pattern.permute.xlu1 %v1032_v44  ;;  %v588_v50 = vadd.f32 %v587_v45, %v1137_v16  ;;  %vm521_vm5 = vcmp.ge.f32.partialorder %v1166_v32, %v1195_v46  ;;  %v1034_v54 = vmov 0.0  }
 0x2bd   : > { %v633_v52 = vadd.f32 %v632_v48, %v1147_v18  ;;  %v664_v53 = vadd.f32 %v663_v49, %v1142_v17  ;;  %v1205_v55 = vsel %vm520_vm4, 1.0, %v1034_v54  ;;  %v869_v56 = vsel %vm521_vm5, 1.0, %v1034_v54 }
 0x2be   : > { %v589_v58 = vrot.slane %v588_v50, 2  ;;  %v535_v59 = vmul.f32 %v869_v56, %v1205_v55  ;;  %v487_v60 = vmul.f32 0.9, %v1162_v30  ;;  %v493_v0 = vmul.f32 0.00038910506, %v491_v51 }
 0x2bf   : > { %v634_v61 = vrot.slane %v633_v52, 2  ;;  %v665_v62 = vrot.slane %v664_v53, 2  ;;  %v1035_v12 = vmov 2056.0   ;;  %v1036_v31 = vmov 7.0  }
 0x2c0   : > { %v543_v57 = vld [vmem:[#allocation5] sm:$0xff]  ;;  %v590_v1 = vadd.f32 %v589_v58, %v588_v50  ;;  %v536_v2 = vsel %vm446_vm3, %v535_v59, 0.0  ;;  %948 = vrcp.f32 %v1035_v12  ;;  %vm694_vm4 = vcmp.eq.s32.totalorder %v1177_v40, 0 }
 0x2c1   : > { %v945_v63 = vpop.eup %944  ;;  %v559_v3 = vmul.f32 %v543_v57, %v535_v59  ;;  %v635_v6 = vadd.f32 %v634_v61, %v633_v52  ;;  %v666_v7 = vadd.f32 %v665_v62, %v664_v53  ;;  %v537_v8 = vrot.slane %v536_v2, 4 }
 0x2c2   : > { %v947_v4 = vpop.eup %946  ;;  %v482_v5 = vmul.f32 0.6931472, %v945_v63  ;;  %v591_v10 = vrot.slane %v590_v1, 1  ;;  %v544_v11 = vsel %vm446_vm3, %v543_v57, 0.0  ;;  %950 = vrcp.f32 %v1036_v31 }
 0x2c3   : > { %v505_v9 = vmul.f32 8.0, %v947_v4  ;;  %v636_v13 = vrot.slane %v635_v6, 1  ;;  %v667_v14 = vrot.slane %v666_v7, 1  ;;  %v538_v15 = vadd.f32 %v537_v8, %v536_v2 }
 0x2c4   : > { %v485_v30 = vadd.f32 %v482_v5, %v477_v42  ;;  %v545_v22 = vrot.slane %v544_v11, 4  ;;  %v560_v23 = vsel %vm446_vm3, %v559_v3, 0.0  ;;  %vm509_vm6 = vweird.f32 %v947_v4 }
 0x2c5   : > { %v506_v19 = vsub.f32 1.0, %v505_v9  ;;  %v539_v21 = vrot.slane %v538_v15, 2  ;;  %v592_v25 = vadd.f32 %v591_v10, %v590_v1  ;;  %v637_v26 = vadd.f32 %v636_v13, %v635_v6 }
 0x2c6   : > { %v489_v20 = vsub.f32 %v485_v30, %v487_v60  ;;  %v668_v28 = vadd.f32 %v667_v14, %v666_v7  ;;  %v1212_v33 = vpop.eup %948  ;;  %v561_v35 = vrot.slane %v560_v23, 4  ;;  %v546_v41 = vadd.f32 %v545_v22, %v544_v11 }
 0x2c7   : > { %v507_v24 = vmul.f32 %v947_v4, %v506_v19  ;;  %v540_v29 = vadd.f32 %v539_v21, %v538_v15  ;;  %v552_v48 = vmul.f32 2056.0, %v1212_v33  ;;  %vm556_vm8 = vweird.f32 %v1212_v33 }
 0x2c8   : > { %v495_v27 = vsub.f32 %v489_v20, %v493_v0  ;;  %v562_v49 = vadd.f32 %v561_v35, %v560_v23  ;;  %v951_v50 = vpop.eup %950  ;;  %v547_v60 = vrot.slane %v546_v41, 2  ;;  %vm701_vm5 = vcmp.eq.s32.totalorder %v1177_v40, 1 }
 0x2c9   : > { %v508_v34 = vadd.f32 %v947_v4, %v507_v24  ;;  %v541_v37 = vrot.slane %v540_v29, 1  ;;  %v553_v62 = vsub.f32 1.0, %v552_v48  ;;  %v603_v0 = vmul.f32 7.0, %v951_v50 }
 0x2ca   : > { %v497_v36 = vsel %vm446_vm3, %v495_v27, 0.0  ;;  %v548_v8 = vadd.f32 %v547_v60, %v546_v41  ;;  %vm607_vm7 = vweird.f32 %v951_v50  ;;  %v492_v60 = vld [vmem:[#allocation4 + $0x8] sm:$0xff] }
 0x2cb   : > { %v498_v38 = vrot.slane %v497_v36, 4  ;;  %v1215_v39 = vsel %vm509_vm6, %v947_v4, %v508_v34  ;;  %v1220_v45 = vadd.f32 %v541_v37, %v540_v29  ;;  %v563_v4 = vrot.slane %v562_v49, 2 }
 0x2cc   : > { %v593_v42 = vmul.f32 %v592_v25, %v1215_v39  ;;  %v638_v43 = vmul.f32 %v637_v26, %v1215_v39  ;;  %v669_v44 = vmul.f32 %v668_v28, %v1215_v39  ;;  %v554_v9 = vmul.f32 %v1212_v33, %v553_v62 }
 0x2cd   : > { %v499_v47 = vadd.f32 %v498_v38, %v497_v36  ;;  %v567_v54 = vmax.f32 %v1220_v45, 1.0  ;;  %v604_v10 = vsub.f32 1.0, %v603_v0  ;;  %v564_v30 = vadd.f32 %v563_v4, %v562_v49 }
 0x2ce   : > { %v594_v51 = vsub.f32 %v1137_v16, %v593_v42  ;;  %v639_v52 = vsub.f32 %v1147_v18, %v638_v43  ;;  %v670_v53 = vsub.f32 %v1142_v17, %v669_v44  ;;  %v480_v18 = vld [vmem:[#allocation3 + $0x8] sm:$0xff]  ;;  %v549_v22 = vrot.slane %v548_v8, 1 }
 0x2cf   : > { %v500_v56 = vrot.slane %v499_v47, 2  ;;  %v568_v63 = vmul.f32 257.0, %v567_v54  ;;  %v605_v14 = vmul.f32 %v951_v50, %v604_v10  ;;  %v555_v25 = vadd.f32 %v1212_v33, %v554_v9 }
 0x2d0   : > { %v595_v57 = vmul.f32 %v594_v51, %v594_v51  ;;  %v640_v58 = vmul.f32 %v639_v52, %v639_v52  ;;  %v671_v59 = vmul.f32 %v670_v53, %v670_v53  ;;  %v565_v26 = vrot.slane %v564_v30, 1 }
 0x2d1   : > { %v501_v61 = vadd.f32 %v500_v56, %v499_v47  ;;  %952 = vrcp.f32 %v568_v63  ;;  %v606_v23 = vadd.f32 %v951_v50, %v605_v14  ;;  %vm574_vm9 = vweird.f32 %v568_v63 }
 0x2d2   : > { %v596_v1 = vrot.slane %v595_v57, 4  ;;  %v641_v2 = vrot.slane %v640_v58, 4  ;;  %v672_v3 = vrot.slane %v671_v59, 4  ;;  %954 = vlog2.f32 %v480_v18 }
 0x2d3   : > { %v502_v16 = vrot.slane %v501_v61, 1  ;;  %v578_v28 = vand.u32 2147483647, %v568_v63  ;;  %v580_v29 = vand.u32 2147483648, %v568_v63  ;;  %v608_v31 = vsel %vm607_vm7, %v951_v50, %v606_v23 }
 0x2d4   : > { %v597_v5 = vadd.f32 %v596_v1, %v595_v57  ;;  %v642_v17 = vadd.f32 %v641_v2, %v640_v58  ;;  %v673_v6 = vadd.f32 %v672_v3, %v671_v59  ;;  %v550_v41 = vadd.f32 %v549_v22, %v548_v8 }
 0x2d5   : > { %v503_v7 = vadd.f32 %v502_v16, %v501_v61  ;;  %v557_v44 = vsel %vm556_vm8, %v1212_v33, %v555_v25  ;;  %v566_v47 = vadd.f32 %v565_v26, %v564_v30  ;;  %v581_v48 = vor.u32 1.1754944e-38, %v580_v29 }
 0x2d6   : > { %v598_v11 = vrot.slane %v597_v5, 2  ;;  %v643_v12 = vrot.slane %v642_v17, 2  ;;  %v674_v19 = vrot.slane %v673_v6, 2  ;;  %vm579_vm12 = vcmp.eq.f32.partialorder %v578_v28, 8.507059e+37 }
 0x2d7   : > { %v511_v13 = vmul.f32 %v1215_v39, %v503_v7  ;;  %v953_v20 = vpop.eup %952  ;;  %v558_v53 = vmul.f32 %v557_v44, %v550_v41  ;;  %vm584_vm13 = vcmp.gt.f32.partialorder %v1220_v45, 0.0  ;;  %v488_v58 = vmul.f32 0.9, %v1166_v32 }
 0x2d8   : > { %v599_v15 = vadd.f32 %v598_v11, %v597_v5  ;;  %v644_v21 = vadd.f32 %v643_v12, %v642_v17  ;;  %v570_v27 = vmul.f32 %v953_v20, %v568_v63  ;;  %v955_v34 = vpop.eup %954  ;;  %v675_v36 = vadd.f32 %v674_v19, %v673_v6 }
 0x2d9   : > { %704 = vperm.xlu0 %941, %v511_v13   ;;  %vm575_vm10 = vweird.f32 %v953_v20  ;;  %v484_v49 = vmul.f32 0.6931472, %v955_v34  ;;  %v494_v3 = vmul.f32 0.00038910506, %v492_v60  ;;  %v526_v12 = vsel %vm446_vm3, %v1205_v55, 0.0 }
 0x2da   : > { %v600_v24 = vrot.slane %v599_v15, 1  ;;  %v571_v37 = vsub.f32 1.0, %v570_v27  ;;  %v645_v38 = vrot.slane %v644_v21, 1  ;;  %vm576_vm11 = vmor %vm574_vm9, %vm575_vm10  ;;  %v676_v51 = vrot.slane %v675_v36, 1 }
 0x2db   : > { %v486_v57 = vadd.f32 %v484_v49, %v1195_v46  ;;  %vm708_vm7 = vcmp.eq.s32.totalorder %v1177_v40, 2  ;;  %vm715_vm8 = vcmp.eq.s32.totalorder %v1177_v40, 3  ;;  %vm722_vm9 = vcmp.eq.s32.totalorder %v1177_v40, 4 }
 0x2dc   : > { %v601_v35 = vadd.f32 %v600_v24, %v599_v15  ;;  %v572_v42 = vmul.f32 %v953_v20, %v571_v37  ;;  %v646_v52 = vadd.f32 %v645_v38, %v644_v21  ;;  %v677_v33 = vadd.f32 %v676_v51, %v675_v36 }
 0x2dd   : > { %v490_v2 = vsub.f32 %v486_v57, %v488_v58  ;;  %vm729_vm10 = vcmp.eq.s32.totalorder %v1177_v40, 5 }
 0x2de   : > { %v609_v43 = vmul.f32 %v608_v31, %v601_v35  ;;  %v573_v50 = vadd.f32 %v953_v20, %v572_v42  ;;  %v1238_v61 = vmul.f32 %v646_v52, %v608_v31  ;;  %v678_v4 = vmul.f32 %v677_v33, %v608_v31 }
 0x2df   : > { %v496_v45 = vsub.f32 %v490_v2, %v494_v3 }
 0x2e0   : > { %956 = vrsqrt.f32 %v609_v43  ;;  %v577_v54 = vsel %vm576_vm11, %v953_v20, %v573_v50  ;;  %vm617_vm14 = vcmp.eq.f32.partialorder %v609_v43, inf  ;;  %v620_v6 = vand.u32 2147483648, %v609_v43 }
 0x2e1   : > { %v582_v56 = vsel %vm579_vm12, %v581_v48, %v577_v54  ;;  %958 = vrsqrt.f32 %v1238_v61  ;;  %v512_v17 = vsel %vm446_vm3, %v496_v45, 0.0  ;;  %vm619_vm15 = vcmp.eq.f32.partialorder %v609_v43, 0.0 }
 0x2e2   : > { %v583_v59 = vmul.f32 %v582_v56, %v566_v47  ;;  %960 = vrsqrt.f32 %v678_v4  ;;  %v513_v9 = vrot.slane %v512_v17, 4  ;;  %vm655_vm0 = vcmp.eq.f32.partialorder %v1238_v61, inf }
 0x2e3   : > { %vm657_vm1 = vcmp.eq.f32.partialorder %v1238_v61, 0.0  ;;  %vm686_vm2 = vcmp.eq.f32.partialorder %v678_v4, inf  ;;  %v689_v49 = vand.u32 2147483648, %v678_v4  ;;  %vm688_vm3 = vcmp.eq.f32.partialorder %v678_v4, 0.0 }
 0x2e4   : > { %v585_v63 = vsel %vm584_vm13, %v583_v59, %v558_v53  ;;  %v514_v15 = vadd.f32 %v513_v9, %v512_v17  ;;  %v1037_v53 = vmov 128.0   ;;  %vm731_vm11 = vcmp.eq.s32.totalorder %v1177_v40, 6 }
 0x2e5   : > { %718 = vperm.xlu2 %943, %v585_v63   ;;  %v586_v0 = vadd.f32 %v585_v63, %v511_v13  ;;  %v527_v13 = vrot.slane %v526_v12, 4  ;;  %962 = vrcp.f32 %v1037_v53  ;;  %vm733_vm12 = vcmp.eq.s32.totalorder %v1177_v40, 7 }
 0x2e6   : > { %v957_v62 = vpop.eup %956  ;;  %v515_v23 = vrot.slane %v514_v15, 2  ;;  %vm735_vm13 = vcmask 57344  }
 0x2e7   : > { %v611_v1 = vmul.f32 %v957_v62, %v609_v43  ;;  %697 = vperm.xlu0 %941, %v586_v0   ;;  %v959_v18 = vpop.eup %958  ;;  %v528_v20 = vadd.f32 %v527_v13, %v526_v12 }
 0x2e8   : > { %v961_v8 = vpop.eup %960  ;;  %v649_v10 = vmul.f32 %v959_v18, %v1238_v61  ;;  %v516_v28 = vadd.f32 %v515_v23, %v514_v15 }
 0x2e9   : > { %v612_v16 = vmul.f32 %v957_v62, %v611_v1  ;;  %v680_v14 = vmul.f32 %v961_v8, %v678_v4  ;;  %v529_v21 = vrot.slane %v528_v20, 2 }
 0x2ea   : > { %v650_v19 = vmul.f32 %v959_v18, %v649_v10  ;;  %v517_v55 = vrot.slane %v516_v28, 1 }
 0x2eb   : > { %v613_v46 = vmul.f32 0.5, %v612_v16  ;;  %v681_v22 = vmul.f32 %v961_v8, %v680_v14  ;;  %v530_v25 = vadd.f32 %v529_v21, %v528_v20  ;;  %v963_v54 = vpop.eup %962 }
 0x2ec   : > { %v651_v24 = vmul.f32 0.5, %v650_v19  ;;  %v518_v41 = vadd.f32 %v517_v55, %v516_v28  ;;  %v625_v57 = vmul.f32 128.0, %v963_v54  ;;  %vm629_vm6 = vweird.f32 %v963_v54 }
 0x2ed   : > { %v614_v32 = vsub.f32 1.5, %v613_v46  ;;  %v531_v26 = vrot.slane %v530_v25, 1  ;;  %v682_v27 = vmul.f32 0.5, %v681_v22 }
 0x2ee   : > { %v652_v29 = vsub.f32 1.5, %v651_v24  ;;  %v519_v47 = vmul.f32 %v518_v41, %v1215_v39  ;;  %v626_v58 = vsub.f32 1.0, %v625_v57 }
 0x2ef   : > { %v615_v5 = vmul.f32 %v957_v62, %v614_v32  ;;  %v532_v31 = vadd.f32 %v531_v26, %v530_v25  ;;  %v683_v35 = vsub.f32 1.5, %v682_v27 }
 0x2f0   : > { %v653_v36 = vmul.f32 %v959_v18, %v652_v29  ;;  %v627_v60 = vmul.f32 %v963_v54, %v626_v58 }
 0x2f1   : > { %v616_v7 = vmul.f32 %v615_v5, %v609_v43  ;;  %v533_v34 = vmul.f32 100.0, %v532_v31  ;;  %v684_v38 = vmul.f32 %v961_v8, %v683_v35 }
 0x2f2   : > { %v654_v42 = vmul.f32 %v653_v36, %v1238_v61  ;;  %v628_v63 = vadd.f32 %v963_v54, %v627_v60 }
 0x2f3   : > { %v618_v11 = vsel %vm617_vm14, %v609_v43, %v616_v7  ;;  %v534_v37 = vmul.f32 %v533_v34, %v1215_v39  ;;  %v658_v43 = vand.u32 2147483648, %v1238_v61  ;;  %v685_v44 = vmul.f32 %v684_v38, %v678_v4 }
 0x2f4   : > { %v621_v30 = vsel %vm619_vm15, %v620_v6, %v618_v11  ;;  %v656_v48 = vsel %vm655_vm0, %v1238_v61, %v654_v42  ;;  %v630_v2 = vsel %vm629_vm6, %v963_v54, %v628_v63 }
 0x2f5   : > { %622 = vadd.xlane.f32.xlu1 %v621_v30  ;;  %v659_v51 = vsel %vm657_vm1, %v658_v43, %v656_v48  ;;  %v687_v50 = vsel %vm686_vm2, %v678_v4, %v685_v44 }
 0x2f6   : > { %v690_v52 = vsel %vm688_vm3, %v689_v49, %v687_v50 }
 0x30e   : > { %711 = vperm.xlu1 %942, %v519_v47   ;;  %660 = vadd.xlane.f32.xlu2 %v659_v51 }
 0x311   : > { %691 = vadd.xlane.f32.xlu0 %v690_v52 }
 0x326   : > { %725 = vperm.xlu2 %943, %v534_v37  }
 0x33f   : > { %v719_v39 = vpop.permute.xlu2 %718 }
 0x34b   : > { %v705_v56 = vpop.permute.xlu0 %704 }
 0x359   : > { %v698_v59 = vpop.permute.xlu0 %697 }
 0x35a   : > { %v700_v62 = vsel %vm694_vm4, %v698_v59, 0.0 }
 0x35b   : > { %v707_v1 = vsel %vm701_vm5, %v705_v56, %v700_v62 }
 0x368   : > { %v623_v33 = vpop.xlane.xlu1 %622 }
 0x369   : > { %v631_v16 = vmul.f32 %v630_v2, %v623_v33 }
 0x380   : > { %v712_v0 = vpop.permute.xlu1 %711 }
 0x381   : > { %v661_v61 = vpop.xlane.xlu2 %660  ;;  %v714_v3 = vsel %vm708_vm7, %v712_v0, %v707_v1 }
 0x382   : > { %v721_v45 = vsel %vm715_vm8, %v719_v39, %v714_v3  ;;  %v662_v18 = vmul.f32 %v661_v61, %v630_v2 }
 0x384   : > { %v692_v4 = vpop.xlane.xlu0 %691 }
 0x385   : > { %v693_v32 = vmul.f32 %v692_v4, %v630_v2 }
 0x389   : > { %v726_v46 = vpop.permute.xlu2 %725 }
 0x38a   : > { %v728_v5 = vsel %vm722_vm9, %v726_v46, %v721_v45 }
 0x38b   : > { %v730_v17 = vsel %vm729_vm10, %v631_v16, %v728_v5 }
 0x38c   : > { %v732_v6 = vsel %vm731_vm11, %v662_v18, %v730_v17 }
 0x38d   : > { %v734_v7 = vsel %vm733_vm12, %v693_v32, %v732_v6 }
 0x38e   : > { %736 = vst.msk [vmem:[%s1299_s3] sm:$0x1] %vm735_vm13, %v734_v7 }
 0x38f PF: > { %s871_s27 = sshll.u32 %s1079_s16, 3  ;;  %s750_s5 = sshll.u32 %s1153_s20, 4  ;;  %s751_s5 = int_to_ptr.vmem [resolvable:$true] %s750_s5 }
 0x390   : > { %s748_s30 = scalar_lea.hbm %s1298_s2, %s871_s27  ;;  %s738_s7 = scalar_lea.sflag [#allocation9], %s1132_s4 }
 0x391   : > { %s752_s6 = sshll.u32 %s748_s30, 4  ;;  %s984_s16 = scalar_lea.hbm %s1298_s2, 24  ;;  %s753_s6 = int_to_ptr.hbm [resolvable:$true] %s752_s6 }
 0x392   : > { %s978_s8 = sshra.s32 %s753_s6, 4  ;;  %s979_s8 = int_to_ptr.hbm [resolvable:$true] %s978_s8 }
 0x393   : > { %s980_s9 = scalar_lea.hbm %s979_s8, 8  ;;  %p985_p4 = scmp.lt.s32.totalorder %s979_s8, %s1298_s2 }
 0x394   : > { %p981_p1 = scmp.ne.s32.totalorder %s979_s8, %s980_s9  ;;  %p986_p5 = scmp.lt.s32.totalorder %s984_s16, %s980_s9 }
 0x396   : > { %p982_p2 = pnand %p981_p1, %p1097_p6  ;;  %p987_p7 = por %p986_p5, %p985_p4 }
 0x398   : > { %p983_p3 = pneg %p982_p2 }
 0x39a   : > { %p988_p9 = pnand %p987_p7, %p983_p3 }
 0x39c   : > { %991 = shalt.err (!%p988_p9)
}
 0x39d   : > { %882 = dma.vmem_to_hbm [thread:$0]  (%p1097_p6), %s751_s5, 128, %s753_s6, %s738_s7  }
 0x39e PF: > { %p888_p10 = scmp.ge.s32.totalorder %s1026_s15, 2  ;;  %s770_s4 = sand.u32 1, %s1014_s12  }
 0x39f   : > { %s771_s20 = scalar_lea.sflag [#allocation9], %s770_s4 }
 0x3a0   : > { %p885_p11 = pnand %p888_p10, %p1101_p8 }
 0x3a2   : > { %p886_p12 = pneg %p885_p11 }
 0x3a4   : > { %1009 = dma.done.wait (%p886_p12), %s771_s20, 128  }
 0x3a5   : > { %1011 = vsyncadd (%p886_p12), %s771_s20, 4294967168  ;;  %p14_p13 = scmp.ge.s32.totalorder %s1083_s18, 5   ;;  %s1302_s12 = smov %s1018_s13 }
 0x3a6   : > { %s1303_s13 = smov %s1022_s14  ;;  %s1304_s14 = smov %s1095_s21 }
 0x3a7   : > { %s1305_s15 = smov %s1083_s18  ;;  %16 = sbr.rel (!%p14_p13) target bundleno = 3 (0x3), region = 125 }
 0x3ac   :  { %777 = vsyncpa [#allocation9], 1 }
 0x3ad   :  { %779 = vsyncpa [#allocation9 + $0x1], 1 }

</bundles_post_ra>
